<compile_context>
chip_gen: v5e
topology: v5e:2x2
jax: 0.10.0
libtpu: 0.0.40
codegen_flags: <defaults>
</compile_context>

<pallas_src>
import math
from math import factorial

import numpy as np
import jax
import jax.numpy as jnp
from jax.experimental import pallas as pl
from jax.experimental.pallas import tpu as pltpu

LMAX = 3
RES_BETA = 20
RES_ALPHA = 41

_LC = 128   # lane chunk of the Z axis inside one grid step
_GC = 128   # sublane chunk of the (padded) grid-point axis Gp


# ----------------------------------------------------------------------------
# Parameter setup (glue, deterministic) -- mirrors e3nn.o3.ToS2Grid(lmax, (20, 41),
# 'integral') as a single dense projection matrix Y[(beta, alpha), i] of real
# spherical harmonics evaluated on the quadrature grid.
# TODO(synk): sign / basis-ordering conventions match standard real SH, not e3nn's
#             internal (y, z, x) convention; structurally equivalent.
# ----------------------------------------------------------------------------
def build_s2grid_matrix(lmax, res_beta, res_alpha):
    betas = (np.arange(res_beta) + 0.5) / res_beta * np.pi
    alphas = np.arange(res_alpha) / res_alpha * 2.0 * np.pi
    ct, st = np.cos(betas), np.sin(betas)

    # Associated Legendre P_l^m(cos beta) via standard recurrences.
    P = {}
    for m in range(lmax + 1):
        pmm = np.ones_like(ct) if m == 0 else P[(m - 1, m - 1)] * (-(2 * m - 1)) * st
        P[(m, m)] = pmm
        if m + 1 <= lmax:
            P[(m + 1, m)] = ct * (2 * m + 1) * pmm
        for l in range(m + 2, lmax + 1):
            P[(l, m)] = (ct * (2 * l - 1) * P[(l - 1, m)]
                         - (l + m - 1) * P[(l - 2, m)]) / (l - m)

    dim = (lmax + 1) ** 2
    Y = np.zeros((res_beta, res_alpha, dim), dtype=np.float64)
    for l in range(lmax + 1):
        for m in range(-l, l + 1):
            i = l * l + l + m
            am = abs(m)
            N = math.sqrt((2 * l + 1) / (4 * math.pi)
                          * factorial(l - am) / factorial(l + am))
            Plm = P[(l, am)][:, None]
            if m == 0:
                Y[:, :, i] = N * Plm * np.ones((1, res_alpha))
            elif m > 0:
                Y[:, :, i] = math.sqrt(2.0) * N * Plm * np.cos(m * alphas)[None, :]
            else:
                Y[:, :, i] = math.sqrt(2.0) * N * Plm * np.sin(am * alphas)[None, :]
    # TODO(synk): e3nn 'integral' normalization also applies per-beta quadrature weights;
    #             omitted here (structural equivalence only).
    return Y.reshape(res_beta * res_alpha, dim).astype(np.float32)


def build_irreps_rotation(key, lmax):
    """Block-diagonal orthogonal matrix on SH coefficients ((lmax+1)^2 square),
    sampled from a random axis/angle like irreps.D_from_axis_angle."""
    k_axis, k_ang, k_blk = jax.random.split(key, 3)
    axis = jax.random.normal(k_axis, (3,))
    axis = axis / jnp.linalg.norm(axis)
    angle = jax.random.uniform(k_ang, ()) * 2.0 * math.pi

    blocks = [jnp.ones((1, 1), jnp.float32)]  # l = 0
    if lmax >= 1:
        x, y, z = axis[0], axis[1], axis[2]
        K = jnp.array([[0.0, -z, y], [z, 0.0, -x], [-y, x, 0.0]])
        R = jnp.eye(3) + jnp.sin(angle) * K + (1.0 - jnp.cos(angle)) * (K @ K)
        # TODO(synk): e3nn's l=1 real-SH basis is the (y, z, x) permutation; unpermuted here.
        blocks.append(R.astype(jnp.float32))
    for l in range(2, lmax + 1):
        # TODO(synk): exact Wigner-D for l>=2 needs e3nn; use a deterministic orthogonal
        # block (QR of key-derived Gaussian), preserving the block-diag orthogonal structure.
        k_blk, sub = jax.random.split(k_blk)
        n = 2 * l + 1
        a = jax.random.normal(sub, (n, n))
        q, r = jnp.linalg.qr(a)
        q = q * jnp.sign(jnp.diagonal(r))[None, :]
        blocks.append(q.astype(jnp.float32))
    return jax.scipy.linalg.block_diag(*blocks).astype(jnp.float32)


def build_fused_projection(D, Y, sublane_multiple=_GC):
    """W = Y @ D, shape (Gp, I): rotation folded into the S2-grid projection, with the
    grid-point axis zero-padded to a multiple of 128. Zero rows contribute exactly 0 to
    |gin - gtg| * gtg^2, so the padding is loss-neutral. Built once per rotation sample,
    outside the per-call kernel path, already in the kernel's (Gp, I) orientation."""
    W = jnp.asarray(Y) @ D                               # (G, I)
    G, _ = W.shape
    Gp = ((G + sublane_multiple - 1) // sublane_multiple) * sublane_multiple
    return jnp.pad(W, ((0, Gp - G), (0, 0)))             # (Gp, I), f32


# ----------------------------------------------------------------------------
# Pallas kernel.
# ----------------------------------------------------------------------------
def _loss_kernel(inp_ref, tgt_ref, w_ref, out_ref, acc_ref):
    # inp_ref / tgt_ref: (I, Zt)  lane-dense coefficient tiles (input / target)
    # w_ref:             (Gp, I)  fused Y@D, zero-padded rows, VMEM-resident (const index_map)
    # out_ref:           (1, 1)   SMEM scalar (written only on the last grid step)
    # acc_ref:           (8, 128) VMEM per-lane partial sums, persistent across grid steps
    step = pl.program_id(0)

    @pl.when(step == 0)
    def _():
        acc_ref[...] = jnp.zeros_like(acc_ref)

    n_i, zt = inp_ref.shape
    gp = w_ref.shape[0]

    acc = acc_ref[...]                                   # single-vreg running partial
    for lc in range(zt // _LC):                          # lane chunks of Z
        x_in = inp_ref[:, lc * _LC:(lc + 1) * _LC]       # (I, 128)
        x_tg = tgt_ref[:, lc * _LC:(lc + 1) * _LC]       # (I, 128)
        for gc in range(gp // _GC):                      # sublane chunks of Gp
            w = w_ref[gc * _GC:(gc + 1) * _GC, :]        # (128, I)
            gin = jnp.dot(w, x_in, preferred_element_type=jnp.float32)   # (128, 128)
            gtg = jnp.dot(w, x_tg, preferred_element_type=jnp.float32)   # (128, 128)
            elem = jnp.abs(gin - gtg) * (gtg * gtg)      # weighted L1, stays in vregs
            # vreg-aligned sublane fold (pure VPU adds) into the (8, 128) partial
            for k in range(_GC // 8):
                acc = acc + elem[k * 8:(k + 1) * 8, :]
    acc_ref[...] = acc

    @pl.when(step == pl.num_programs(0) - 1)
    def _():
        out_ref[0, 0] = jnp.sum(acc_ref[...])            # one-time XLU collapse


def weighted_grid_loss_pallas(inp, tgt, w_pad, *, z_tile=512):
    B, C, I = inp.shape
    Z = B * C
    Gp, I_w = w_pad.shape
    assert I_w == I and Gp % _GC == 0

    # Lane tile along Z: multiple of 128, at most z_tile, clamped for tiny problems.
    zp_min = ((Z + _LC - 1) // _LC) * _LC
    Zt = max(_LC, min((z_tile // _LC) * _LC, zp_min))
    Zp = ((zp_min + Zt - 1) // Zt) * Zt
    num_tiles = Zp // Zt

    # Transpose + zero-pad once (zero columns contribute 0 to the loss).
    xT = jnp.pad(inp.reshape(Z, I).T.astype(jnp.float32), ((0, 0), (0, Zp - Z)))
    yT = jnp.pad(tgt.reshape(Z, I).T.astype(jnp.float32), ((0, 0), (0, Zp - Z)))

    cost = pl.CostEstimate(
        flops=2 * 2 * Zp * I * Gp + 4 * Zp * Gp,
        transcendentals=0,
        bytes_accessed=(2 * Zp * I + Gp * I) * 4 + 4,
    )

    total = pl.pallas_call(
        _loss_kernel,
        out_shape=jax.ShapeDtypeStruct((1, 1), jnp.float32),
        grid_spec=pltpu.PrefetchScalarGridSpec(
            num_scalar_prefetch=0,
            grid=(num_tiles,),
            in_specs=[
                pl.BlockSpec((I, Zt), lambda i: (0, i)),    # input coeffs (pipelined)
                pl.BlockSpec((I, Zt), lambda i: (0, i)),    # target coeffs (pipelined)
                pl.BlockSpec((Gp, I), lambda i: (0, 0)),    # W: fetched once, resident
            ],
            out_specs=pl.BlockSpec((1, 1), lambda i: (0, 0),
                                   memory_space=pltpu.MemorySpace.SMEM),
            scratch_shapes=[pltpu.VMEM((8, _LC), jnp.float32)],
        ),
        compiler_params=pltpu.CompilerParams(
            dimension_semantics=("arbitrary",),   # carries the accumulator
        ),
        cost_estimate=cost,
    )(xT, yT, w_pad)

    # sum over (C, beta, alpha) per batch element, then mean over batch == total / B (glue)
    return total[0, 0] / B


# ----------------------------------------------------------------------------
# Pure-JAX reference for verification (uses unfused, unpadded D and Y).
# ----------------------------------------------------------------------------
def reference_loss(inp, tgt, D, Y):
    B, C, _ = inp.shape
    rin = jnp.einsum('ij,bcj->bci', D, inp)
    rtg = jnp.einsum('ij,bcj->bci', D, tgt)
    gin = jnp.einsum('gi,bci->bcg', Y, rin).reshape(B, C, RES_BETA, RES_ALPHA)
    gtg = jnp.einsum('gi,bci->bcg', Y, rtg).reshape(B, C, RES_BETA, RES_ALPHA)
    loss = jnp.abs(gin - gtg) * gtg ** 2
    return jnp.mean(jnp.sum(loss, axis=(1, 2, 3)))


if __name__ == "__main__":
    key = jax.random.PRNGKey(0)
    k_in, k_tg, k_rot = jax.random.split(key, 3)

    B, C = 2, 4
    I = (LMAX + 1) ** 2  # 16
    inp = jax.random.normal(k_in, (B, C, I), dtype=jnp.float32)
    tgt = jax.random.normal(k_tg, (B, C, I), dtype=jnp.float32)

    D = build_irreps_rotation(k_rot, LMAX)                           # (16, 16)
    Y = jnp.asarray(build_s2grid_matrix(LMAX, RES_BETA, RES_ALPHA))  # (820, 16)
    W = build_fused_projection(D, Y)                                 # (896, 16), zero-padded

    loss = weighted_grid_loss_pallas(inp, tgt, W)
    loss = jax.block_until_ready(loss)

    ref = reference_loss(inp, tgt, D, Y)
    assert jnp.allclose(loss, ref, rtol=1e-4, atol=1e-4), (loss, ref)
    print("KERNEL_OK")
</pallas_src>

<mosaic_0001>
module attributes {stable_mosaic.version = 11 : i64} {
  func.func @_loss_kernel(%arg0: i32, %arg1: memref<16x128xf32, #tpu.memory_space<vmem>>, %arg2: memref<16x128xf32, #tpu.memory_space<vmem>>, %arg3: memref<896x16xf32, #tpu.memory_space<vmem>>, %arg4: memref<1x1xf32, #tpu.memory_space<smem>>, %arg5: memref<8x128xf32, #tpu.memory_space<vmem>>) attributes {dimension_semantics = [#tpu.dimension_semantics<arbitrary>], iteration_bounds = array<i64: 1>, scalar_prefetch = 0 : i64, scratch_operands = 1 : i64, tpu.core_type = #tpu.core_type<tc>, window_params = [{transform_indices = @transform_0, window_bounds = array<i64: 16, 128>}, {transform_indices = @transform_1, window_bounds = array<i64: 16, 128>}, {pipeline_mode = #tpu.pipeline_mode<synchronous>, transform_indices = @transform_2, window_bounds = array<i64: 896, 16>}, {transform_indices = @transform_3, window_bounds = array<i64: 1, 1>}]} {
    %c0_i32 = arith.constant 0 : i32
    %0 = arith.cmpi eq, %arg0, %c0_i32 : i32
    %1 = arith.extui %0 : i1 to i32
    %c0_i32_0 = arith.constant 0 : i32
    %2 = arith.cmpi ne, %1, %c0_i32_0 : i32
    scf.if %2 {
      %cst_31 = arith.constant 0.000000e+00 : f32
      %283 = vector.broadcast %cst_31 : f32 to vector<8x128xf32>
      %c0_32 = arith.constant 0 : index
      %c0_33 = arith.constant 0 : index
      %284 = vector.load %arg5[%c0_32, %c0_33] : memref<8x128xf32, #tpu.memory_space<vmem>>, vector<8x128xf32>
      tpu.vector_store %arg5[%c0_32, %c0_33], %283 {strides = array<i32>} : memref<8x128xf32, #tpu.memory_space<vmem>>, vector<8x128xf32>,
    } else {
    }
    %c0 = arith.constant 0 : index
    %c0_1 = arith.constant 0 : index
    %3 = vector.load %arg5[%c0, %c0_1] : memref<8x128xf32, #tpu.memory_space<vmem>>, vector<8x128xf32>
    %c0_2 = arith.constant 0 : index
    %c0_3 = arith.constant 0 : index
    %4 = vector.load %arg1[%c0_2, %c0_3] : memref<16x128xf32, #tpu.memory_space<vmem>>, vector<16x128xf32>
    %c0_4 = arith.constant 0 : index
    %c0_5 = arith.constant 0 : index
    %5 = vector.load %arg2[%c0_4, %c0_5] : memref<16x128xf32, #tpu.memory_space<vmem>>, vector<16x128xf32>
    %c0_6 = arith.constant 0 : index
    %c0_7 = arith.constant 0 : index
    %6 = vector.load %arg3[%c0_6, %c0_7] : memref<896x16xf32, #tpu.memory_space<vmem>>, vector<128x16xf32>
    %cst = arith.constant dense<0.000000e+00> : vector<128x128xf32>
    %7 = tpu.matmul %6, %4, %cst {dimension_numbers = #tpu.dot_dimension_numbers<[1], [0], [0], [1], [0, 0, 1, 1], [], []>} : vector<128x16xf32>, vector<16x128xf32>, vector<128x128xf32> -> vector<128x128xf32>
    %cst_8 = arith.constant dense<0.000000e+00> : vector<128x128xf32>
    %8 = tpu.matmul %6, %5, %cst_8 {dimension_numbers = #tpu.dot_dimension_numbers<[1], [0], [0], [1], [0, 0, 1, 1], [], []>} : vector<128x16xf32>, vector<16x128xf32>, vector<128x128xf32> -> vector<128x128xf32>
    %9 = arith.subf %7, %8 : vector<128x128xf32>
    %10 = math.absf %9 : vector<128x128xf32>
    %11 = arith.mulf %8, %8 : vector<128x128xf32>
    %12 = arith.mulf %10, %11 : vector<128x128xf32>
    %13 = vector.extract_strided_slice %12 {offsets = [0, 0], sizes = [8, 128], strides = [1, 1]} : vector<128x128xf32> to vector<8x128xf32>
    %14 = arith.addf %3, %13 : vector<8x128xf32>
    %15 = vector.extract_strided_slice %12 {offsets = [8, 0], sizes = [8, 128], strides = [1, 1]} : vector<128x128xf32> to vector<8x128xf32>
    %16 = arith.addf %14, %15 : vector<8x128xf32>
    %17 = vector.extract_strided_slice %12 {offsets = [16, 0], sizes = [8, 128], strides = [1, 1]} : vector<128x128xf32> to vector<8x128xf32>
    %18 = arith.addf %16, %17 : vector<8x128xf32>
    %19 = vector.extract_strided_slice %12 {offsets = [24, 0], sizes = [8, 128], strides = [1, 1]} : vector<128x128xf32> to vector<8x128xf32>
    %20 = arith.addf %18, %19 : vector<8x128xf32>
    %21 = vector.extract_strided_slice %12 {offsets = [32, 0], sizes = [8, 128], strides = [1, 1]} : vector<128x128xf32> to vector<8x128xf32>
    %22 = arith.addf %20, %21 : vector<8x128xf32>
    %23 = vector.extract_strided_slice %12 {offsets = [40, 0], sizes = [8, 128], strides = [1, 1]} : vector<128x128xf32> to vector<8x128xf32>
    %24 = arith.addf %22, %23 : vector<8x128xf32>
    %25 = vector.extract_strided_slice %12 {offsets = [48, 0], sizes = [8, 128], strides = [1, 1]} : vector<128x128xf32> to vector<8x128xf32>
    %26 = arith.addf %24, %25 : vector<8x128xf32>
    %27 = vector.extract_strided_slice %12 {offsets = [56, 0], sizes = [8, 128], strides = [1, 1]} : vector<128x128xf32> to vector<8x128xf32>
    %28 = arith.addf %26, %27 : vector<8x128xf32>
    %29 = vector.extract_strided_slice %12 {offsets = [64, 0], sizes = [8, 128], strides = [1, 1]} : vector<128x128xf32> to vector<8x128xf32>
    %30 = arith.addf %28, %29 : vector<8x128xf32>
    %31 = vector.extract_strided_slice %12 {offsets = [72, 0], sizes = [8, 128], strides = [1, 1]} : vector<128x128xf32> to vector<8x128xf32>
    %32 = arith.addf %30, %31 : vector<8x128xf32>
    %33 = vector.extract_strided_slice %12 {offsets = [80, 0], sizes = [8, 128], strides = [1, 1]} : vector<128x128xf32> to vector<8x128xf32>
    %34 = arith.addf %32, %33 : vector<8x128xf32>
    %35 = vector.extract_strided_slice %12 {offsets = [88, 0], sizes = [8, 128], strides = [1, 1]} : vector<128x128xf32> to vector<8x128xf32>
    %36 = arith.addf %34, %35 : vector<8x128xf32>
    %37 = vector.extract_strided_slice %12 {offsets = [96, 0], sizes = [8, 128], strides = [1, 1]} : vector<128x128xf32> to vector<8x128xf32>
    %38 = arith.addf %36, %37 : vector<8x128xf32>
    %39 = vector.extract_strided_slice %12 {offsets = [104, 0], sizes = [8, 128], strides = [1, 1]} : vector<128x128xf32> to vector<8x128xf32>
    %40 = arith.addf %38, %39 : vector<8x128xf32>
    %41 = vector.extract_strided_slice %12 {offsets = [112, 0], sizes = [8, 128], strides = [1, 1]} : vector<128x128xf32> to vector<8x128xf32>
    %42 = arith.addf %40, %41 : vector<8x128xf32>
    %43 = vector.extract_strided_slice %12 {offsets = [120, 0], sizes = [8, 128], strides = [1, 1]} : vector<128x128xf32> to vector<8x128xf32>
    %44 = arith.addf %42, %43 : vector<8x128xf32>
    %c128 = arith.constant 128 : index
    %c0_9 = arith.constant 0 : index
    %45 = vector.load %arg3[%c128, %c0_9] : memref<896x16xf32, #tpu.memory_space<vmem>>, vector<128x16xf32>
    %cst_10 = arith.constant dense<0.000000e+00> : vector<128x128xf32>
    %46 = tpu.matmul %45, %4, %cst_10 {dimension_numbers = #tpu.dot_dimension_numbers<[1], [0], [0], [1], [0, 0, 1, 1], [], []>} : vector<128x16xf32>, vector<16x128xf32>, vector<128x128xf32> -> vector<128x128xf32>
    %cst_11 = arith.constant dense<0.000000e+00> : vector<128x128xf32>
    %47 = tpu.matmul %45, %5, %cst_11 {dimension_numbers = #tpu.dot_dimension_numbers<[1], [0], [0], [1], [0, 0, 1, 1], [], []>} : vector<128x16xf32>, vector<16x128xf32>, vector<128x128xf32> -> vector<128x128xf32>
    %48 = arith.subf %46, %47 : vector<128x128xf32>
    %49 = math.absf %48 : vector<128x128xf32>
    %50 = arith.mulf %47, %47 : vector<128x128xf32>
    %51 = arith.mulf %49, %50 : vector<128x128xf32>
    %52 = vector.extract_strided_slice %51 {offsets = [0, 0], sizes = [8, 128], strides = [1, 1]} : vector<128x128xf32> to vector<8x128xf32>
    %53 = arith.addf %44, %52 : vector<8x128xf32>
    %54 = vector.extract_strided_slice %51 {offsets = [8, 0], sizes = [8, 128], strides = [1, 1]} : vector<128x128xf32> to vector<8x128xf32>
    %55 = arith.addf %53, %54 : vector<8x128xf32>
    %56 = vector.extract_strided_slice %51 {offsets = [16, 0], sizes = [8, 128], strides = [1, 1]} : vector<128x128xf32> to vector<8x128xf32>
    %57 = arith.addf %55, %56 : vector<8x128xf32>
    %58 = vector.extract_strided_slice %51 {offsets = [24, 0], sizes = [8, 128], strides = [1, 1]} : vector<128x128xf32> to vector<8x128xf32>
    %59 = arith.addf %57, %58 : vector<8x128xf32>
    %60 = vector.extract_strided_slice %51 {offsets = [32, 0], sizes = [8, 128], strides = [1, 1]} : vector<128x128xf32> to vector<8x128xf32>
    %61 = arith.addf %59, %60 : vector<8x128xf32>
    %62 = vector.extract_strided_slice %51 {offsets = [40, 0], sizes = [8, 128], strides = [1, 1]} : vector<128x128xf32> to vector<8x128xf32>
    %63 = arith.addf %61, %62 : vector<8x128xf32>
    %64 = vector.extract_strided_slice %51 {offsets = [48, 0], sizes = [8, 128], strides = [1, 1]} : vector<128x128xf32> to vector<8x128xf32>
    %65 = arith.addf %63, %64 : vector<8x128xf32>
    %66 = vector.extract_strided_slice %51 {offsets = [56, 0], sizes = [8, 128], strides = [1, 1]} : vector<128x128xf32> to vector<8x128xf32>
    %67 = arith.addf %65, %66 : vector<8x128xf32>
    %68 = vector.extract_strided_slice %51 {offsets = [64, 0], sizes = [8, 128], strides = [1, 1]} : vector<128x128xf32> to vector<8x128xf32>
    %69 = arith.addf %67, %68 : vector<8x128xf32>
    %70 = vector.extract_strided_slice %51 {offsets = [72, 0], sizes = [8, 128], strides = [1, 1]} : vector<128x128xf32> to vector<8x128xf32>
    %71 = arith.addf %69, %70 : vector<8x128xf32>
    %72 = vector.extract_strided_slice %51 {offsets = [80, 0], sizes = [8, 128], strides = [1, 1]} : vector<128x128xf32> to vector<8x128xf32>
    %73 = arith.addf %71, %72 : vector<8x128xf32>
    %74 = vector.extract_strided_slice %51 {offsets = [88, 0], sizes = [8, 128], strides = [1, 1]} : vector<128x128xf32> to vector<8x128xf32>
    %75 = arith.addf %73, %74 : vector<8x128xf32>
    %76 = vector.extract_strided_slice %51 {offsets = [96, 0], sizes = [8, 128], strides = [1, 1]} : vector<128x128xf32> to vector<8x128xf32>
    %77 = arith.addf %75, %76 : vector<8x128xf32>
    %78 = vector.extract_strided_slice %51 {offsets = [104, 0], sizes = [8, 128], strides = [1, 1]} : vector<128x128xf32> to vector<8x128xf32>
    %79 = arith.addf %77, %78 : vector<8x128xf32>
    %80 = vector.extract_strided_slice %51 {offsets = [112, 0], sizes = [8, 128], strides = [1, 1]} : vector<128x128xf32> to vector<8x128xf32>
    %81 = arith.addf %79, %80 : vector<8x128xf32>
    %82 = vector.extract_strided_slice %51 {offsets = [120, 0], sizes = [8, 128], strides = [1, 1]} : vector<128x128xf32> to vector<8x128xf32>
    %83 = arith.addf %81, %82 : vector<8x128xf32>
    %c256 = arith.constant 256 : index
    %c0_12 = arith.constant 0 : index
    %84 = vector.load %arg3[%c256, %c0_12] : memref<896x16xf32, #tpu.memory_space<vmem>>, vector<128x16xf32>
    %cst_13 = arith.constant dense<0.000000e+00> : vector<128x128xf32>
    %85 = tpu.matmul %84, %4, %cst_13 {dimension_numbers = #tpu.dot_dimension_numbers<[1], [0], [0], [1], [0, 0, 1, 1], [], []>} : vector<128x16xf32>, vector<16x128xf32>, vector<128x128xf32> -> vector<128x128xf32>
    %cst_14 = arith.constant dense<0.000000e+00> : vector<128x128xf32>
    %86 = tpu.matmul %84, %5, %cst_14 {dimension_numbers = #tpu.dot_dimension_numbers<[1], [0], [0], [1], [0, 0, 1, 1], [], []>} : vector<128x16xf32>, vector<16x128xf32>, vector<128x128xf32> -> vector<128x128xf32>
    %87 = arith.subf %85, %86 : vector<128x128xf32>
    %88 = math.absf %87 : vector<128x128xf32>
    %89 = arith.mulf %86, %86 : vector<128x128xf32>
    %90 = arith.mulf %88, %89 : vector<128x128xf32>
    %91 = vector.extract_strided_slice %90 {offsets = [0, 0], sizes = [8, 128], strides = [1, 1]} : vector<128x128xf32> to vector<8x128xf32>
    %92 = arith.addf %83, %91 : vector<8x128xf32>
    %93 = vector.extract_strided_slice %90 {offsets = [8, 0], sizes = [8, 128], strides = [1, 1]} : vector<128x128xf32> to vector<8x128xf32>
    %94 = arith.addf %92, %93 : vector<8x128xf32>
    %95 = vector.extract_strided_slice %90 {offsets = [16, 0], sizes = [8, 128], strides = [1, 1]} : vector<128x128xf32> to vector<8x128xf32>
    %96 = arith.addf %94, %95 : vector<8x128xf32>
    %97 = vector.extract_strided_slice %90 {offsets = [24, 0], sizes = [8, 128], strides = [1, 1]} : vector<128x128xf32> to vector<8x128xf32>
    %98 = arith.addf %96, %97 : vector<8x128xf32>
    %99 = vector.extract_strided_slice %90 {offsets = [32, 0], sizes = [8, 128], strides = [1, 1]} : vector<128x128xf32> to vector<8x128xf32>
    %100 = arith.addf %98, %99 : vector<8x128xf32>
    %101 = vector.extract_strided_slice %90 {offsets = [40, 0], sizes = [8, 128], strides = [1, 1]} : vector<128x128xf32> to vector<8x128xf32>
    %102 = arith.addf %100, %101 : vector<8x128xf32>
    %103 = vector.extract_strided_slice %90 {offsets = [48, 0], sizes = [8, 128], strides = [1, 1]} : vector<128x128xf32> to vector<8x128xf32>
    %104 = arith.addf %102, %103 : vector<8x128xf32>
    %105 = vector.extract_strided_slice %90 {offsets = [56, 0], sizes = [8, 128], strides = [1, 1]} : vector<128x128xf32> to vector<8x128xf32>
    %106 = arith.addf %104, %105 : vector<8x128xf32>
    %107 = vector.extract_strided_slice %90 {offsets = [64, 0], sizes = [8, 128], strides = [1, 1]} : vector<128x128xf32> to vector<8x128xf32>
    %108 = arith.addf %106, %107 : vector<8x128xf32>
    %109 = vector.extract_strided_slice %90 {offsets = [72, 0], sizes = [8, 128], strides = [1, 1]} : vector<128x128xf32> to vector<8x128xf32>
    %110 = arith.addf %108, %109 : vector<8x128xf32>
    %111 = vector.extract_strided_slice %90 {offsets = [80, 0], sizes = [8, 128], strides = [1, 1]} : vector<128x128xf32> to vector<8x128xf32>
    %112 = arith.addf %110, %111 : vector<8x128xf32>
    %113 = vector.extract_strided_slice %90 {offsets = [88, 0], sizes = [8, 128], strides = [1, 1]} : vector<128x128xf32> to vector<8x128xf32>
    %114 = arith.addf %112, %113 : vector<8x128xf32>
    %115 = vector.extract_strided_slice %90 {offsets = [96, 0], sizes = [8, 128], strides = [1, 1]} : vector<128x128xf32> to vector<8x128xf32>
    %116 = arith.addf %114, %115 : vector<8x128xf32>
    %117 = vector.extract_strided_slice %90 {offsets = [104, 0], sizes = [8, 128], strides = [1, 1]} : vector<128x128xf32> to vector<8x128xf32>
    %118 = arith.addf %116, %117 : vector<8x128xf32>
    %119 = vector.extract_strided_slice %90 {offsets = [112, 0], sizes = [8, 128], strides = [1, 1]} : vector<128x128xf32> to vector<8x128xf32>
    %120 = arith.addf %118, %119 : vector<8x128xf32>
    %121 = vector.extract_strided_slice %90 {offsets = [120, 0], sizes = [8, 128], strides = [1, 1]} : vector<128x128xf32> to vector<8x128xf32>
    %122 = arith.addf %120, %121 : vector<8x128xf32>
    %c384 = arith.constant 384 : index
    %c0_15 = arith.constant 0 : index
    %123 = vector.load %arg3[%c384, %c0_15] : memref<896x16xf32, #tpu.memory_space<vmem>>, vector<128x16xf32>
    %cst_16 = arith.constant dense<0.000000e+00> : vector<128x128xf32>
    %124 = tpu.matmul %123, %4, %cst_16 {dimension_numbers = #tpu.dot_dimension_numbers<[1], [0], [0], [1], [0, 0, 1, 1], [], []>} : vector<128x16xf32>, vector<16x128xf32>, vector<128x128xf32> -> vector<128x128xf32>
    %cst_17 = arith.constant dense<0.000000e+00> : vector<128x128xf32>
    %125 = tpu.matmul %123, %5, %cst_17 {dimension_numbers = #tpu.dot_dimension_numbers<[1], [0], [0], [1], [0, 0, 1, 1], [], []>} : vector<128x16xf32>, vector<16x128xf32>, vector<128x128xf32> -> vector<128x128xf32>
    %126 = arith.subf %124, %125 : vector<128x128xf32>
    %127 = math.absf %126 : vector<128x128xf32>
    %128 = arith.mulf %125, %125 : vector<128x128xf32>
    %129 = arith.mulf %127, %128 : vector<128x128xf32>
    %130 = vector.extract_strided_slice %129 {offsets = [0, 0], sizes = [8, 128], strides = [1, 1]} : vector<128x128xf32> to vector<8x128xf32>
    %131 = arith.addf %122, %130 : vector<8x128xf32>
    %132 = vector.extract_strided_slice %129 {offsets = [8, 0], sizes = [8, 128], strides = [1, 1]} : vector<128x128xf32> to vector<8x128xf32>
    %133 = arith.addf %131, %132 : vector<8x128xf32>
    %134 = vector.extract_strided_slice %129 {offsets = [16, 0], sizes = [8, 128], strides = [1, 1]} : vector<128x128xf32> to vector<8x128xf32>
    %135 = arith.addf %133, %134 : vector<8x128xf32>
    %136 = vector.extract_strided_slice %129 {offsets = [24, 0], sizes = [8, 128], strides = [1, 1]} : vector<128x128xf32> to vector<8x128xf32>
    %137 = arith.addf %135, %136 : vector<8x128xf32>
    %138 = vector.extract_strided_slice %129 {offsets = [32, 0], sizes = [8, 128], strides = [1, 1]} : vector<128x128xf32> to vector<8x128xf32>
    %139 = arith.addf %137, %138 : vector<8x128xf32>
    %140 = vector.extract_strided_slice %129 {offsets = [40, 0], sizes = [8, 128], strides = [1, 1]} : vector<128x128xf32> to vector<8x128xf32>
    %141 = arith.addf %139, %140 : vector<8x128xf32>
    %142 = vector.extract_strided_slice %129 {offsets = [48, 0], sizes = [8, 128], strides = [1, 1]} : vector<128x128xf32> to vector<8x128xf32>
    %143 = arith.addf %141, %142 : vector<8x128xf32>
    %144 = vector.extract_strided_slice %129 {offsets = [56, 0], sizes = [8, 128], strides = [1, 1]} : vector<128x128xf32> to vector<8x128xf32>
    %145 = arith.addf %143, %144 : vector<8x128xf32>
    %146 = vector.extract_strided_slice %129 {offsets = [64, 0], sizes = [8, 128], strides = [1, 1]} : vector<128x128xf32> to vector<8x128xf32>
    %147 = arith.addf %145, %146 : vector<8x128xf32>
    %148 = vector.extract_strided_slice %129 {offsets = [72, 0], sizes = [8, 128], strides = [1, 1]} : vector<128x128xf32> to vector<8x128xf32>
    %149 = arith.addf %147, %148 : vector<8x128xf32>
    %150 = vector.extract_strided_slice %129 {offsets = [80, 0], sizes = [8, 128], strides = [1, 1]} : vector<128x128xf32> to vector<8x128xf32>
    %151 = arith.addf %149, %150 : vector<8x128xf32>
    %152 = vector.extract_strided_slice %129 {offsets = [88, 0], sizes = [8, 128], strides = [1, 1]} : vector<128x128xf32> to vector<8x128xf32>
    %153 = arith.addf %151, %152 : vector<8x128xf32>
    %154 = vector.extract_strided_slice %129 {offsets = [96, 0], sizes = [8, 128], strides = [1, 1]} : vector<128x128xf32> to vector<8x128xf32>
    %155 = arith.addf %153, %154 : vector<8x128xf32>
    %156 = vector.extract_strided_slice %129 {offsets = [104, 0], sizes = [8, 128], strides = [1, 1]} : vector<128x128xf32> to vector<8x128xf32>
    %157 = arith.addf %155, %156 : vector<8x128xf32>
    %158 = vector.extract_strided_slice %129 {offsets = [112, 0], sizes = [8, 128], strides = [1, 1]} : vector<128x128xf32> to vector<8x128xf32>
    %159 = arith.addf %157, %158 : vector<8x128xf32>
    %160 = vector.extract_strided_slice %129 {offsets = [120, 0], sizes = [8, 128], strides = [1, 1]} : vector<128x128xf32> to vector<8x128xf32>
    %161 = arith.addf %159, %160 : vector<8x128xf32>
    %c512 = arith.constant 512 : index
    %c0_18 = arith.constant 0 : index
    %162 = vector.load %arg3[%c512, %c0_18] : memref<896x16xf32, #tpu.memory_space<vmem>>, vector<128x16xf32>
    %cst_19 = arith.constant dense<0.000000e+00> : vector<128x128xf32>
    %163 = tpu.matmul %162, %4, %cst_19 {dimension_numbers = #tpu.dot_dimension_numbers<[1], [0], [0], [1], [0, 0, 1, 1], [], []>} : vector<128x16xf32>, vector<16x128xf32>, vector<128x128xf32> -> vector<128x128xf32>
    %cst_20 = arith.constant dense<0.000000e+00> : vector<128x128xf32>
    %164 = tpu.matmul %162, %5, %cst_20 {dimension_numbers = #tpu.dot_dimension_numbers<[1], [0], [0], [1], [0, 0, 1, 1], [], []>} : vector<128x16xf32>, vector<16x128xf32>, vector<128x128xf32> -> vector<128x128xf32>
    %165 = arith.subf %163, %164 : vector<128x128xf32>
    %166 = math.absf %165 : vector<128x128xf32>
    %167 = arith.mulf %164, %164 : vector<128x128xf32>
    %168 = arith.mulf %166, %167 : vector<128x128xf32>
    %169 = vector.extract_strided_slice %168 {offsets = [0, 0], sizes = [8, 128], strides = [1, 1]} : vector<128x128xf32> to vector<8x128xf32>
    %170 = arith.addf %161, %169 : vector<8x128xf32>
    %171 = vector.extract_strided_slice %168 {offsets = [8, 0], sizes = [8, 128], strides = [1, 1]} : vector<128x128xf32> to vector<8x128xf32>
    %172 = arith.addf %170, %171 : vector<8x128xf32>
    %173 = vector.extract_strided_slice %168 {offsets = [16, 0], sizes = [8, 128], strides = [1, 1]} : vector<128x128xf32> to vector<8x128xf32>
    %174 = arith.addf %172, %173 : vector<8x128xf32>
    %175 = vector.extract_strided_slice %168 {offsets = [24, 0], sizes = [8, 128], strides = [1, 1]} : vector<128x128xf32> to vector<8x128xf32>
    %176 = arith.addf %174, %175 : vector<8x128xf32>
    %177 = vector.extract_strided_slice %168 {offsets = [32, 0], sizes = [8, 128], strides = [1, 1]} : vector<128x128xf32> to vector<8x128xf32>
    %178 = arith.addf %176, %177 : vector<8x128xf32>
    %179 = vector.extract_strided_slice %168 {offsets = [40, 0], sizes = [8, 128], strides = [1, 1]} : vector<128x128xf32> to vector<8x128xf32>
    %180 = arith.addf %178, %179 : vector<8x128xf32>
    %181 = vector.extract_strided_slice %168 {offsets = [48, 0], sizes = [8, 128], strides = [1, 1]} : vector<128x128xf32> to vector<8x128xf32>
    %182 = arith.addf %180, %181 : vector<8x128xf32>
    %183 = vector.extract_strided_slice %168 {offsets = [56, 0], sizes = [8, 128], strides = [1, 1]} : vector<128x128xf32> to vector<8x128xf32>
    %184 = arith.addf %182, %183 : vector<8x128xf32>
    %185 = vector.extract_strided_slice %168 {offsets = [64, 0], sizes = [8, 128], strides = [1, 1]} : vector<128x128xf32> to vector<8x128xf32>
    %186 = arith.addf %184, %185 : vector<8x128xf32>
    %187 = vector.extract_strided_slice %168 {offsets = [72, 0], sizes = [8, 128], strides = [1, 1]} : vector<128x128xf32> to vector<8x128xf32>
    %188 = arith.addf %186, %187 : vector<8x128xf32>
    %189 = vector.extract_strided_slice %168 {offsets = [80, 0], sizes = [8, 128], strides = [1, 1]} : vector<128x128xf32> to vector<8x128xf32>
    %190 = arith.addf %188, %189 : vector<8x128xf32>
    %191 = vector.extract_strided_slice %168 {offsets = [88, 0], sizes = [8, 128], strides = [1, 1]} : vector<128x128xf32> to vector<8x128xf32>
    %192 = arith.addf %190, %191 : vector<8x128xf32>
    %193 = vector.extract_strided_slice %168 {offsets = [96, 0], sizes = [8, 128], strides = [1, 1]} : vector<128x128xf32> to vector<8x128xf32>
    %194 = arith.addf %192, %193 : vector<8x128xf32>
    %195 = vector.extract_strided_slice %168 {offsets = [104, 0], sizes = [8, 128], strides = [1, 1]} : vector<128x128xf32> to vector<8x128xf32>
    %196 = arith.addf %194, %195 : vector<8x128xf32>
    %197 = vector.extract_strided_slice %168 {offsets = [112, 0], sizes = [8, 128], strides = [1, 1]} : vector<128x128xf32> to vector<8x128xf32>
    %198 = arith.addf %196, %197 : vector<8x128xf32>
    %199 = vector.extract_strided_slice %168 {offsets = [120, 0], sizes = [8, 128], strides = [1, 1]} : vector<128x128xf32> to vector<8x128xf32>
    %200 = arith.addf %198, %199 : vector<8x128xf32>
    %c640 = arith.constant 640 : index
    %c0_21 = arith.constant 0 : index
    %201 = vector.load %arg3[%c640, %c0_21] : memref<896x16xf32, #tpu.memory_space<vmem>>, vector<128x16xf32>
    %cst_22 = arith.constant dense<0.000000e+00> : vector<128x128xf32>
    %202 = tpu.matmul %201, %4, %cst_22 {dimension_numbers = #tpu.dot_dimension_numbers<[1], [0], [0], [1], [0, 0, 1, 1], [], []>} : vector<128x16xf32>, vector<16x128xf32>, vector<128x128xf32> -> vector<128x128xf32>
    %cst_23 = arith.constant dense<0.000000e+00> : vector<128x128xf32>
    %203 = tpu.matmul %201, %5, %cst_23 {dimension_numbers = #tpu.dot_dimension_numbers<[1], [0], [0], [1], [0, 0, 1, 1], [], []>} : vector<128x16xf32>, vector<16x128xf32>, vector<128x128xf32> -> vector<128x128xf32>
    %204 = arith.subf %202, %203 : vector<128x128xf32>
    %205 = math.absf %204 : vector<128x128xf32>
    %206 = arith.mulf %203, %203 : vector<128x128xf32>
    %207 = arith.mulf %205, %206 : vector<128x128xf32>
    %208 = vector.extract_strided_slice %207 {offsets = [0, 0], sizes = [8, 128], strides = [1, 1]} : vector<128x128xf32> to vector<8x128xf32>
    %209 = arith.addf %200, %208 : vector<8x128xf32>
    %210 = vector.extract_strided_slice %207 {offsets = [8, 0], sizes = [8, 128], strides = [1, 1]} : vector<128x128xf32> to vector<8x128xf32>
    %211 = arith.addf %209, %210 : vector<8x128xf32>
    %212 = vector.extract_strided_slice %207 {offsets = [16, 0], sizes = [8, 128], strides = [1, 1]} : vector<128x128xf32> to vector<8x128xf32>
    %213 = arith.addf %211, %212 : vector<8x128xf32>
    %214 = vector.extract_strided_slice %207 {offsets = [24, 0], sizes = [8, 128], strides = [1, 1]} : vector<128x128xf32> to vector<8x128xf32>
    %215 = arith.addf %213, %214 : vector<8x128xf32>
    %216 = vector.extract_strided_slice %207 {offsets = [32, 0], sizes = [8, 128], strides = [1, 1]} : vector<128x128xf32> to vector<8x128xf32>
    %217 = arith.addf %215, %216 : vector<8x128xf32>
    %218 = vector.extract_strided_slice %207 {offsets = [40, 0], sizes = [8, 128], strides = [1, 1]} : vector<128x128xf32> to vector<8x128xf32>
    %219 = arith.addf %217, %218 : vector<8x128xf32>
    %220 = vector.extract_strided_slice %207 {offsets = [48, 0], sizes = [8, 128], strides = [1, 1]} : vector<128x128xf32> to vector<8x128xf32>
    %221 = arith.addf %219, %220 : vector<8x128xf32>
    %222 = vector.extract_strided_slice %207 {offsets = [56, 0], sizes = [8, 128], strides = [1, 1]} : vector<128x128xf32> to vector<8x128xf32>
    %223 = arith.addf %221, %222 : vector<8x128xf32>
    %224 = vector.extract_strided_slice %207 {offsets = [64, 0], sizes = [8, 128], strides = [1, 1]} : vector<128x128xf32> to vector<8x128xf32>
    %225 = arith.addf %223, %224 : vector<8x128xf32>
    %226 = vector.extract_strided_slice %207 {offsets = [72, 0], sizes = [8, 128], strides = [1, 1]} : vector<128x128xf32> to vector<8x128xf32>
    %227 = arith.addf %225, %226 : vector<8x128xf32>
    %228 = vector.extract_strided_slice %207 {offsets = [80, 0], sizes = [8, 128], strides = [1, 1]} : vector<128x128xf32> to vector<8x128xf32>
    %229 = arith.addf %227, %228 : vector<8x128xf32>
    %230 = vector.extract_strided_slice %207 {offsets = [88, 0], sizes = [8, 128], strides = [1, 1]} : vector<128x128xf32> to vector<8x128xf32>
    %231 = arith.addf %229, %230 : vector<8x128xf32>
    %232 = vector.extract_strided_slice %207 {offsets = [96, 0], sizes = [8, 128], strides = [1, 1]} : vector<128x128xf32> to vector<8x128xf32>
    %233 = arith.addf %231, %232 : vector<8x128xf32>
    %234 = vector.extract_strided_slice %207 {offsets = [104, 0], sizes = [8, 128], strides = [1, 1]} : vector<128x128xf32> to vector<8x128xf32>
    %235 = arith.addf %233, %234 : vector<8x128xf32>
    %236 = vector.extract_strided_slice %207 {offsets = [112, 0], sizes = [8, 128], strides = [1, 1]} : vector<128x128xf32> to vector<8x128xf32>
    %237 = arith.addf %235, %236 : vector<8x128xf32>
    %238 = vector.extract_strided_slice %207 {offsets = [120, 0], sizes = [8, 128], strides = [1, 1]} : vector<128x128xf32> to vector<8x128xf32>
    %239 = arith.addf %237, %238 : vector<8x128xf32>
    %c768 = arith.constant 768 : index
    %c0_24 = arith.constant 0 : index
    %240 = vector.load %arg3[%c768, %c0_24] : memref<896x16xf32, #tpu.memory_space<vmem>>, vector<128x16xf32>
    %cst_25 = arith.constant dense<0.000000e+00> : vector<128x128xf32>
    %241 = tpu.matmul %240, %4, %cst_25 {dimension_numbers = #tpu.dot_dimension_numbers<[1], [0], [0], [1], [0, 0, 1, 1], [], []>} : vector<128x16xf32>, vector<16x128xf32>, vector<128x128xf32> -> vector<128x128xf32>
    %cst_26 = arith.constant dense<0.000000e+00> : vector<128x128xf32>
    %242 = tpu.matmul %240, %5, %cst_26 {dimension_numbers = #tpu.dot_dimension_numbers<[1], [0], [0], [1], [0, 0, 1, 1], [], []>} : vector<128x16xf32>, vector<16x128xf32>, vector<128x128xf32> -> vector<128x128xf32>
    %243 = arith.subf %241, %242 : vector<128x128xf32>
    %244 = math.absf %243 : vector<128x128xf32>
    %245 = arith.mulf %242, %242 : vector<128x128xf32>
    %246 = arith.mulf %244, %245 : vector<128x128xf32>
    %247 = vector.extract_strided_slice %246 {offsets = [0, 0], sizes = [8, 128], strides = [1, 1]} : vector<128x128xf32> to vector<8x128xf32>
    %248 = arith.addf %239, %247 : vector<8x128xf32>
    %249 = vector.extract_strided_slice %246 {offsets = [8, 0], sizes = [8, 128], strides = [1, 1]} : vector<128x128xf32> to vector<8x128xf32>
    %250 = arith.addf %248, %249 : vector<8x128xf32>
    %251 = vector.extract_strided_slice %246 {offsets = [16, 0], sizes = [8, 128], strides = [1, 1]} : vector<128x128xf32> to vector<8x128xf32>
    %252 = arith.addf %250, %251 : vector<8x128xf32>
    %253 = vector.extract_strided_slice %246 {offsets = [24, 0], sizes = [8, 128], strides = [1, 1]} : vector<128x128xf32> to vector<8x128xf32>
    %254 = arith.addf %252, %253 : vector<8x128xf32>
    %255 = vector.extract_strided_slice %246 {offsets = [32, 0], sizes = [8, 128], strides = [1, 1]} : vector<128x128xf32> to vector<8x128xf32>
    %256 = arith.addf %254, %255 : vector<8x128xf32>
    %257 = vector.extract_strided_slice %246 {offsets = [40, 0], sizes = [8, 128], strides = [1, 1]} : vector<128x128xf32> to vector<8x128xf32>
    %258 = arith.addf %256, %257 : vector<8x128xf32>
    %259 = vector.extract_strided_slice %246 {offsets = [48, 0], sizes = [8, 128], strides = [1, 1]} : vector<128x128xf32> to vector<8x128xf32>
    %260 = arith.addf %258, %259 : vector<8x128xf32>
    %261 = vector.extract_strided_slice %246 {offsets = [56, 0], sizes = [8, 128], strides = [1, 1]} : vector<128x128xf32> to vector<8x128xf32>
    %262 = arith.addf %260, %261 : vector<8x128xf32>
    %263 = vector.extract_strided_slice %246 {offsets = [64, 0], sizes = [8, 128], strides = [1, 1]} : vector<128x128xf32> to vector<8x128xf32>
    %264 = arith.addf %262, %263 : vector<8x128xf32>
    %265 = vector.extract_strided_slice %246 {offsets = [72, 0], sizes = [8, 128], strides = [1, 1]} : vector<128x128xf32> to vector<8x128xf32>
    %266 = arith.addf %264, %265 : vector<8x128xf32>
    %267 = vector.extract_strided_slice %246 {offsets = [80, 0], sizes = [8, 128], strides = [1, 1]} : vector<128x128xf32> to vector<8x128xf32>
    %268 = arith.addf %266, %267 : vector<8x128xf32>
    %269 = vector.extract_strided_slice %246 {offsets = [88, 0], sizes = [8, 128], strides = [1, 1]} : vector<128x128xf32> to vector<8x128xf32>
    %270 = arith.addf %268, %269 : vector<8x128xf32>
    %271 = vector.extract_strided_slice %246 {offsets = [96, 0], sizes = [8, 128], strides = [1, 1]} : vector<128x128xf32> to vector<8x128xf32>
    %272 = arith.addf %270, %271 : vector<8x128xf32>
    %273 = vector.extract_strided_slice %246 {offsets = [104, 0], sizes = [8, 128], strides = [1, 1]} : vector<128x128xf32> to vector<8x128xf32>
    %274 = arith.addf %272, %273 : vector<8x128xf32>
    %275 = vector.extract_strided_slice %246 {offsets = [112, 0], sizes = [8, 128], strides = [1, 1]} : vector<128x128xf32> to vector<8x128xf32>
    %276 = arith.addf %274, %275 : vector<8x128xf32>
    %277 = vector.extract_strided_slice %246 {offsets = [120, 0], sizes = [8, 128], strides = [1, 1]} : vector<128x128xf32> to vector<8x128xf32>
    %278 = arith.addf %276, %277 : vector<8x128xf32>
    %c0_27 = arith.constant 0 : index
    %c0_28 = arith.constant 0 : index
    %279 = vector.load %arg5[%c0_27, %c0_28] : memref<8x128xf32, #tpu.memory_space<vmem>>, vector<8x128xf32>
    tpu.vector_store %arg5[%c0_27, %c0_28], %278 {strides = array<i32>} : memref<8x128xf32, #tpu.memory_space<vmem>>, vector<8x128xf32>,
    %c0_i32_29 = arith.constant 0 : i32
    %280 = arith.cmpi eq, %arg0, %c0_i32_29 : i32
    %281 = arith.extui %280 : i1 to i32
    %c0_i32_30 = arith.constant 0 : i32
    %282 = arith.cmpi ne, %281, %c0_i32_30 : i32
    scf.if %282 {
      %c0_31 = arith.constant 0 : index
      %c0_32 = arith.constant 0 : index
      %283 = vector.load %arg5[%c0_31, %c0_32] : memref<8x128xf32, #tpu.memory_space<vmem>>, vector<8x128xf32>
      %284 = vector.shape_cast %283 : vector<8x128xf32> to vector<1x8x128xf32>
      %cst_33 = arith.constant dense<0.000000e+00> : vector<1xf32>
      %285 = vector.multi_reduction <add>, %284, %cst_33 [1, 2] : vector<1x8x128xf32> to vector<1xf32>
      %286 = vector.shape_cast %285 : vector<1xf32> to vector<1x1x1xf32>
      %287 = vector.extract %286[0, 0, 0] : f32 from vector<1x1x1xf32>
      %c0_34 = arith.constant 0 : index
      %c0_35 = arith.constant 0 : index
      %288 = memref.load %arg4[%c0_34, %c0_35] : memref<1x1xf32, #tpu.memory_space<smem>>
      memref.store %287, %arg4[%c0_34, %c0_35] : memref<1x1xf32, #tpu.memory_space<smem>>
    } else {
    }
    return
  }
  func.func @transform_0(%arg0: i32) -> (i32, i32) {
    %c0_i32 = arith.constant 0 : i32
    %c0_i32_0 = arith.constant 0 : i32
    return %c0_i32, %arg0 : i32, i32
  }
  func.func @transform_1(%arg0: i32) -> (i32, i32) {
    %c0_i32 = arith.constant 0 : i32
    %c0_i32_0 = arith.constant 0 : i32
    return %c0_i32, %arg0 : i32, i32
  }
  func.func @transform_2(%arg0: i32) -> (i32, i32) {
    %c0_i32 = arith.constant 0 : i32
    %c0_i32_0 = arith.constant 0 : i32
    %c0_i32_1 = arith.constant 0 : i32
    return %c0_i32, %c0_i32_0 : i32, i32
  }
  func.func @transform_3(%arg0: i32) -> (i32, i32) {
    %c0_i32 = arith.constant 0 : i32
    %c0_i32_0 = arith.constant 0 : i32
    %c0_i32_1 = arith.constant 0 : i32
    return %c0_i32, %c0_i32_0 : i32, i32
  }
}

</mosaic_0001>

<bundles_post_ra>
// kernel: tpu_custom_call.1
= control target key start
LH: loop header
LB: loop body
LE: loop exit
PB: predicated region body
PF: predicated region fallthrough
CT: control target
= control target key end

     0   :  { %vm41_vm0 = vcmask 130048   ;;  %s3175_s0 = inlined_call_operand.vmem [shape: f32[16,128], index: 0, kind: input, shape index: {}]   ;;  %s3176_s1 = inlined_call_operand.vmem [shape: f32[16,128], index: 1, kind: input, shape index: {}]   ;;  %s3177_s2 = inlined_call_operand.vmem [shape: f32[896,16], index: 2, kind: input, shape index: {}]   ;;  %s3178_s3 = inlined_call_operand.hbm [shape: f32[1,1], index: 3, kind: output, shape index: {}]  }
   0x1   :  { %v2244_v0 = vld [vmem:[%s3175_s0 + $0x8] sm:$0xff]  ;;  %v2254_v2 = vld [vmem:[%s3175_s0] sm:$0xff] }
   0x2   :  { %v2249_v1 = vld [vmem:[%s3176_s1 + $0x8] sm:$0xff]  ;;  %104 = vmatpush.msra.mxu0 %v2244_v0  ;;  %2199 = vmatpush.msra.mxu2 %v2244_v0  ;;  %v2261_v3 = vld [vmem:[%s3176_s1] sm:$0xff] }
   0x3   :  { %169 = vmatpush.msra.mxu1 %v2249_v1  ;;  %2201 = vmatpush.msra.mxu3 %v2249_v1  ;;  %v25_v4 = vld [vmem:[%s3177_s2] sm:$0xff] }
   0x4   :  { %v33_v5 = vld [vmem:[%s3177_s2 + $0x40] sm:$0xff]  ;;  %105 = vmatpush.msra.mxu0 %v2254_v2  ;;  %2200 = vmatpush.msra.mxu2 %v2254_v2 }
   0x5   :  { %170 = vmatpush.msra.mxu1 %v2261_v3  ;;  %2202 = vmatpush.msra.mxu3 %v2261_v3 }
   0x6   :  { %8 = vsyncpa [#allocation4], 0  ;;  %1975 = vmatmul.msk.f32.vlgmr.msra.gmra.mxu0 %vm41_vm0, %v25_v4  ;;  %1983 = vmatmul.msk.f32.vlgmr.msra.gmra.mxu2 %vm41_vm0, %v33_v5  ;;  %v26_v6 = vld [vmem:[%s3177_s2 + $0x8] sm:$0xff]  ;;  %v27_v8 = vld [vmem:[%s3177_s2 + $0x10] sm:$0xff]  ;;  %s1965_s13 = sshll.u32 %s3178_s3, 4  ;;  %s2220_s15 = smov [#allocation3]   ;;  %s1966_s13 = int_to_ptr.hbm [resolvable:$true] %s1965_s13 }
   0x7   :  { %1991 = vmatmul.msk.f32.vlgmr.msra.gmra.mxu1 %vm41_vm0, %v25_v4  ;;  %1999 = vmatmul.msk.f32.vlgmr.msra.gmra.mxu3 %vm41_vm0, %v33_v5  ;;  %v34_v7 = vld [vmem:[%s3177_s2 + $0x48] sm:$0xff]  ;;  %v35_v9 = vld [vmem:[%s3177_s2 + $0x50] sm:$0xff]  ;;  %v28_v10 = vld [vmem:[%s3177_s2 + $0x18] sm:$0xff] }
   0x8   :  { %378 = vmatpush.msrb.mxu2 %v2244_v0  ;;  %443 = vmatpush.msrb.mxu3 %v2249_v1  ;;  %v36_v11 = vld [vmem:[%s3177_s2 + $0x58] sm:$0xff]  ;;  %v29_v12 = vld [vmem:[%s3177_s2 + $0x20] sm:$0xff]  ;;  %v30_v14 = vld [vmem:[%s3177_s2 + $0x28] sm:$0xff] }
   0x9   :  { %652 = vmatpush.msrb.mxu0 %v2244_v0  ;;  %717 = vmatpush.msrb.mxu1 %v2249_v1  ;;  %v37_v13 = vld [vmem:[%s3177_s2 + $0x60] sm:$0xff]  ;;  %v38_v15 = vld [vmem:[%s3177_s2 + $0x68] sm:$0xff]  ;;  %v31_v16 = vld [vmem:[%s3177_s2 + $0x30] sm:$0xff] }
   0xa   :  { %379 = vmatpush.msrb.mxu2 %v2254_v2  ;;  %444 = vmatpush.msrb.mxu3 %v2261_v3  ;;  %v39_v17 = vld [vmem:[%s3177_s2 + $0x70] sm:$0xff]  ;;  %v32_v18 = vld [vmem:[%s3177_s2 + $0x38] sm:$0xff]  ;;  %v300_v20 = vld [vmem:[%s3177_s2 + $0x80] sm:$0xff] }
   0xb   :  { %653 = vmatpush.msrb.mxu0 %v2254_v2  ;;  %718 = vmatpush.msrb.mxu1 %v2261_v3  ;;  %v40_v19 = vld [vmem:[%s3177_s2 + $0x78] sm:$0xff]  ;;  %v574_v21 = vld [vmem:[%s3177_s2 + $0x100] sm:$0xff]  ;;  %v301_v22 = vld [vmem:[%s3177_s2 + $0x88] sm:$0xff] }
   0xc   :  { %926 = vmatpush.msra.mxu2 %v2244_v0  ;;  %991 = vmatpush.msra.mxu3 %v2249_v1  ;;  %v575_v23 = vld [vmem:[%s3177_s2 + $0x108] sm:$0xff]  ;;  %v302_v24 = vld [vmem:[%s3177_s2 + $0x90] sm:$0xff]  ;;  %v303_v26 = vld [vmem:[%s3177_s2 + $0x98] sm:$0xff] }
   0xd   :  { %1200 = vmatpush.msra.mxu0 %v2244_v0  ;;  %1265 = vmatpush.msra.mxu1 %v2249_v1  ;;  %v576_v25 = vld [vmem:[%s3177_s2 + $0x110] sm:$0xff]  ;;  %v577_v27 = vld [vmem:[%s3177_s2 + $0x118] sm:$0xff]  ;;  %v304_v28 = vld [vmem:[%s3177_s2 + $0xa0] sm:$0xff] }
   0xe   :  { %1976 = vmatmul.msk.f32.gmra.mxu0 %vm41_vm0, %v26_v6  ;;  %1984 = vmatmul.msk.f32.gmra.mxu2 %vm41_vm0, %v34_v7  ;;  %v578_v29 = vld [vmem:[%s3177_s2 + $0x120] sm:$0xff]  ;;  %v305_v30 = vld [vmem:[%s3177_s2 + $0xa8] sm:$0xff]  ;;  %v306_v32 = vld [vmem:[%s3177_s2 + $0xb0] sm:$0xff] }
   0xf   :  { %1992 = vmatmul.msk.f32.gmra.mxu1 %vm41_vm0, %v26_v6  ;;  %2000 = vmatmul.msk.f32.gmra.mxu3 %vm41_vm0, %v34_v7  ;;  %v579_v31 = vld [vmem:[%s3177_s2 + $0x128] sm:$0xff]  ;;  %v580_v33 = vld [vmem:[%s3177_s2 + $0x130] sm:$0xff]  ;;  %v307_v34 = vld [vmem:[%s3177_s2 + $0xb8] sm:$0xff] }
  0x10   :  { %927 = vmatpush.msra.mxu2 %v2254_v2  ;;  %992 = vmatpush.msra.mxu3 %v2261_v3  ;;  %v581_v35 = vld [vmem:[%s3177_s2 + $0x138] sm:$0xff]  ;;  %v308_v37 = vld [vmem:[%s3177_s2 + $0xc0] sm:$0xff]  ;;  %v309_v44 = vld [vmem:[%s3177_s2 + $0xc8] sm:$0xff] }
  0x11   :  { %1201 = vmatpush.msra.mxu0 %v2254_v2  ;;  %1266 = vmatpush.msra.mxu1 %v2261_v3  ;;  %v582_v41 = vld [vmem:[%s3177_s2 + $0x140] sm:$0xff]  ;;  %v583_v51 = vld [vmem:[%s3177_s2 + $0x148] sm:$0xff]  ;;  %v310_v54 = vld [vmem:[%s3177_s2 + $0xd0] sm:$0xff] }
  0x12   :  { %v584_v61 = vld [vmem:[%s3177_s2 + $0x150] sm:$0xff] }
  0x16   :  { %1977 = vmatmul.msk.f32.gmra.mxu0 %vm41_vm0, %v27_v8  ;;  %1985 = vmatmul.msk.f32.gmra.mxu2 %vm41_vm0, %v35_v9 }
  0x17   :  { %1993 = vmatmul.msk.f32.gmra.mxu1 %vm41_vm0, %v27_v8  ;;  %2001 = vmatmul.msk.f32.gmra.mxu3 %vm41_vm0, %v35_v9  ;;  %v585_v9 = vld [vmem:[%s3177_s2 + $0x158] sm:$0xff] }
  0x1e   :  { %1978 = vmatmul.msk.f32.gmra.mxu0 %vm41_vm0, %v28_v10  ;;  %1986 = vmatmul.msk.f32.gmra.mxu2 %vm41_vm0, %v36_v11 }
  0x1f   :  { %1994 = vmatmul.msk.f32.gmra.mxu1 %vm41_vm0, %v28_v10  ;;  %2002 = vmatmul.msk.f32.gmra.mxu3 %vm41_vm0, %v36_v11 }
  0x26   :  { %1979 = vmatmul.msk.f32.gmra.mxu0 %vm41_vm0, %v29_v12  ;;  %1987 = vmatmul.msk.f32.gmra.mxu2 %vm41_vm0, %v37_v13 }
  0x27   :  { %1995 = vmatmul.msk.f32.gmra.mxu1 %vm41_vm0, %v29_v12  ;;  %2003 = vmatmul.msk.f32.gmra.mxu3 %vm41_vm0, %v37_v13  ;;  %v312_v12 = vld [vmem:[%s3177_s2 + $0xe0] sm:$0xff] }
  0x2e   :  { %1980 = vmatmul.msk.f32.gmra.mxu0 %vm41_vm0, %v30_v14  ;;  %1988 = vmatmul.msk.f32.gmra.mxu2 %vm41_vm0, %v38_v15 }
  0x2f   :  { %1996 = vmatmul.msk.f32.gmra.mxu1 %vm41_vm0, %v30_v14  ;;  %2004 = vmatmul.msk.f32.gmra.mxu3 %vm41_vm0, %v38_v15 }
  0x36   :  { %1981 = vmatmul.msk.f32.gmra.mxu0 %vm41_vm0, %v31_v16  ;;  %1989 = vmatmul.msk.f32.gmra.mxu2 %vm41_vm0, %v39_v17 }
  0x37   :  { %1997 = vmatmul.msk.f32.gmra.mxu1 %vm41_vm0, %v31_v16  ;;  %2005 = vmatmul.msk.f32.gmra.mxu3 %vm41_vm0, %v39_v17 }
  0x3e   :  { %1982 = vmatmul.msk.f32.gmra.mxu0 %vm41_vm0, %v32_v18  ;;  %1990 = vmatmul.msk.f32.gmra.mxu2 %vm41_vm0, %v40_v19 }
  0x3f   :  { %1998 = vmatmul.msk.f32.gmra.mxu1 %vm41_vm0, %v32_v18  ;;  %2006 = vmatmul.msk.f32.gmra.mxu3 %vm41_vm0, %v40_v19 }
  0x46   :  { %2007 = vmatmul.msk.f32.vlgmr.msrb.gmra.mxu2 %vm41_vm0, %v300_v20  ;;  %2039 = vmatmul.msk.f32.vlgmr.msrb.gmra.mxu0 %vm41_vm0, %v574_v21 }
  0x47   :  { %2023 = vmatmul.msk.f32.vlgmr.msrb.gmra.mxu3 %vm41_vm0, %v300_v20  ;;  %1474 = vmatpush.msrb.mxu2 %v2244_v0 }
  0x48   :  { %2055 = vmatmul.msk.f32.vlgmr.msrb.gmra.mxu1 %vm41_vm0, %v574_v21  ;;  %1539 = vmatpush.msrb.mxu3 %v2249_v1 }
  0x49   :  { %1748 = vmatpush.msrb.mxu0 %v2244_v0  ;;  %1813 = vmatpush.msrb.mxu1 %v2249_v1  ;;  %v311_v0 = vld [vmem:[%s3177_s2 + $0xd8] sm:$0xff] }
  0x4a   :  { %1475 = vmatpush.msrb.mxu2 %v2254_v2  ;;  %1540 = vmatpush.msrb.mxu3 %v2261_v3 }
  0x4b   :  { %1749 = vmatpush.msrb.mxu0 %v2254_v2  ;;  %1814 = vmatpush.msrb.mxu1 %v2261_v3 }
  0x4e   :  { %2008 = vmatmul.msk.f32.gmra.mxu2 %vm41_vm0, %v301_v22  ;;  %2040 = vmatmul.msk.f32.gmra.mxu0 %vm41_vm0, %v575_v23 }
  0x4f   :  { %2024 = vmatmul.msk.f32.gmra.mxu3 %vm41_vm0, %v301_v22 }
  0x50   :  { %2056 = vmatmul.msk.f32.gmra.mxu1 %vm41_vm0, %v575_v23 }
  0x56   :  { %2009 = vmatmul.msk.f32.gmra.mxu2 %vm41_vm0, %v302_v24  ;;  %2041 = vmatmul.msk.f32.gmra.mxu0 %vm41_vm0, %v576_v25 }
  0x57   :  { %2025 = vmatmul.msk.f32.gmra.mxu3 %vm41_vm0, %v302_v24 }
  0x58   :  { %2057 = vmatmul.msk.f32.gmra.mxu1 %vm41_vm0, %v576_v25 }
  0x5e   :  { %2010 = vmatmul.msk.f32.gmra.mxu2 %vm41_vm0, %v303_v26  ;;  %2042 = vmatmul.msk.f32.gmra.mxu0 %vm41_vm0, %v577_v27 }
  0x5f   :  { %2026 = vmatmul.msk.f32.gmra.mxu3 %vm41_vm0, %v303_v26 }
  0x60   :  { %2058 = vmatmul.msk.f32.gmra.mxu1 %vm41_vm0, %v577_v27 }
  0x66   :  { %2011 = vmatmul.msk.f32.gmra.mxu2 %vm41_vm0, %v304_v28  ;;  %2043 = vmatmul.msk.f32.gmra.mxu0 %vm41_vm0, %v578_v29 }
  0x67   :  { %2027 = vmatmul.msk.f32.gmra.mxu3 %vm41_vm0, %v304_v28 }
  0x68   :  { %2059 = vmatmul.msk.f32.gmra.mxu1 %vm41_vm0, %v578_v29  ;;  %v586_v29 = vld [vmem:[%s3177_s2 + $0x160] sm:$0xff] }
  0x6e   :  { %2012 = vmatmul.msk.f32.gmra.mxu2 %vm41_vm0, %v305_v30  ;;  %2044 = vmatmul.msk.f32.gmra.mxu0 %vm41_vm0, %v579_v31 }
  0x6f   :  { %2028 = vmatmul.msk.f32.gmra.mxu3 %vm41_vm0, %v305_v30 }
  0x70   :  { %2060 = vmatmul.msk.f32.gmra.mxu1 %vm41_vm0, %v579_v31 }
  0x76   :  { %2013 = vmatmul.msk.f32.gmra.mxu2 %vm41_vm0, %v306_v32  ;;  %2045 = vmatmul.msk.f32.gmra.mxu0 %vm41_vm0, %v580_v33 }
  0x77   :  { %2029 = vmatmul.msk.f32.gmra.mxu3 %vm41_vm0, %v306_v32  ;;  %v313_v32 = vld [vmem:[%s3177_s2 + $0xe8] sm:$0xff] }
  0x78   :  { %2061 = vmatmul.msk.f32.gmra.mxu1 %vm41_vm0, %v580_v33 }
  0x7e   :  { %2014 = vmatmul.msk.f32.gmra.mxu2 %vm41_vm0, %v307_v34  ;;  %2046 = vmatmul.msk.f32.gmra.mxu0 %vm41_vm0, %v581_v35 }
  0x7f   :  { %2030 = vmatmul.msk.f32.gmra.mxu3 %vm41_vm0, %v307_v34 }
  0x80   :  { %2062 = vmatmul.msk.f32.gmra.mxu1 %vm41_vm0, %v581_v35 }
  0x83   :  { %v107_v36 = vpop.f32.mrf.mxu0 }
  0x84   :  { %v172_v38 = vpop.f32.mrf.mxu1 }
  0x85   :  { %v220_v5 = vsub.f32 %v107_v36, %v172_v38  ;;  %v252_v15 = vmul.f32 %v172_v38, %v172_v38 }
  0x86   :  { %2015 = vmatmul.msk.f32.gmra.mxu2 %vm41_vm0, %v308_v37  ;;  %2047 = vmatmul.msk.f32.gmra.mxu0 %vm41_vm0, %v582_v41 }
  0x87   :  { %2031 = vmatmul.msk.f32.gmra.mxu3 %vm41_vm0, %v308_v37  ;;  %v236_v14 = vand.u32 2147483647, %v220_v5  ;;  %v588_v5 = vld [vmem:[%s3177_s2 + $0x170] sm:$0xff] }
  0x88   :  { %2063 = vmatmul.msk.f32.gmra.mxu1 %vm41_vm0, %v582_v41 }
  0x89   :  { %v131_v39 = vpop.f32.mrf.mxu2  ;;  %v268_v22 = vmul.f32 %v252_v15, %v236_v14 }
  0x8a   :  { %v196_v40 = vpop.f32.mrf.mxu3 }
  0x8b   :  { %v228_v42 = vsub.f32 %v131_v39, %v196_v40  ;;  %v110_v43 = vpop.f32.mrf.mxu0  ;;  %v260_v47 = vmul.f32 %v196_v40, %v196_v40 }
  0x8c   :  { %v175_v45 = vpop.f32.mrf.mxu1 }
  0x8d   :  { %v244_v46 = vand.u32 2147483647, %v228_v42  ;;  %v221_v7 = vsub.f32 %v110_v43, %v175_v45  ;;  %v253_v19 = vmul.f32 %v175_v45, %v175_v45 }
  0x8e   :  { %2016 = vmatmul.msk.f32.gmra.mxu2 %vm41_vm0, %v309_v44  ;;  %2048 = vmatmul.msk.f32.gmra.mxu0 %vm41_vm0, %v583_v51 }
  0x8f   :  { %v2467_v48 = vmul.f32 %v260_v47, %v244_v46  ;;  %2032 = vmatmul.msk.f32.gmra.mxu3 %vm41_vm0, %v309_v44  ;;  %v237_v18 = vand.u32 2147483647, %v221_v7  ;;  %v587_v46 = vld [vmem:[%s3177_s2 + $0x168] sm:$0xff] }
  0x90   :  { %2064 = vmatmul.msk.f32.gmra.mxu1 %vm41_vm0, %v583_v51 }
  0x91   :  { %v134_v49 = vpop.f32.mrf.mxu2  ;;  %v269_v24 = vmul.f32 %v253_v19, %v237_v18 }
  0x92   :  { %v199_v50 = vpop.f32.mrf.mxu3 }
  0x93   :  { %v229_v52 = vsub.f32 %v134_v49, %v199_v50  ;;  %v113_v53 = vpop.f32.mrf.mxu0  ;;  %v261_v57 = vmul.f32 %v199_v50, %v199_v50  ;;  %v285_v36 = vadd.f32 %v269_v24, %v268_v22 }
  0x94   :  { %v178_v55 = vpop.f32.mrf.mxu1 }
  0x95   :  { %v245_v56 = vand.u32 2147483647, %v229_v52  ;;  %v222_v20 = vsub.f32 %v113_v53, %v178_v55  ;;  %v254_v26 = vmul.f32 %v178_v55, %v178_v55  ;;  %v314_v53 = vld [vmem:[%s3177_s2 + $0xf0] sm:$0xff] }
  0x96   :  { %2017 = vmatmul.msk.f32.gmra.mxu2 %vm41_vm0, %v310_v54  ;;  %2049 = vmatmul.msk.f32.gmra.mxu0 %vm41_vm0, %v584_v61 }
  0x97   :  { %v2479_v58 = vmul.f32 %v261_v57, %v245_v56  ;;  %2033 = vmatmul.msk.f32.gmra.mxu3 %vm41_vm0, %v310_v54  ;;  %v238_v25 = vand.u32 2147483647, %v222_v20 }
  0x98   :  { %2065 = vmatmul.msk.f32.gmra.mxu1 %vm41_vm0, %v584_v61 }
  0x99   :  { %v137_v59 = vpop.f32.mrf.mxu2  ;;  %v270_v37 = vmul.f32 %v254_v26, %v238_v25  ;;  %v589_v25 = vld [vmem:[%s3177_s2 + $0x178] sm:$0xff] }
  0x9a   :  { %v202_v60 = vpop.f32.mrf.mxu3 }
  0x9b   :  { %v230_v62 = vsub.f32 %v137_v59, %v202_v60  ;;  %v116_v63 = vpop.f32.mrf.mxu0  ;;  %v262_v3 = vmul.f32 %v202_v60, %v202_v60  ;;  %v286_v43 = vadd.f32 %v285_v36, %v270_v37 }
  0x9c   :  { %v181_v1 = vpop.f32.mrf.mxu1 }
  0x9d   :  { %v246_v2 = vand.u32 2147483647, %v230_v62  ;;  %v223_v27 = vsub.f32 %v116_v63, %v181_v1  ;;  %v255_v39 = vmul.f32 %v181_v1, %v181_v1 }
  0x9e   :  { %2018 = vmatmul.msk.f32.gmra.mxu2 %vm41_vm0, %v311_v0  ;;  %2050 = vmatmul.msk.f32.gmra.mxu0 %vm41_vm0, %v585_v9 }
  0x9f   :  { %v2491_v4 = vmul.f32 %v262_v3, %v246_v2  ;;  %2034 = vmatmul.msk.f32.gmra.mxu3 %vm41_vm0, %v311_v0  ;;  %v239_v38 = vand.u32 2147483647, %v223_v27 }
  0xa0   :  { %2066 = vmatmul.msk.f32.gmra.mxu1 %vm41_vm0, %v585_v9 }
  0xa1   :  { %v140_v6 = vpop.f32.mrf.mxu2  ;;  %v271_v44 = vmul.f32 %v255_v39, %v239_v38 }
  0xa2   :  { %v205_v8 = vpop.f32.mrf.mxu3 }
  0xa3   :  { %v231_v10 = vsub.f32 %v140_v6, %v205_v8  ;;  %v119_v11 = vpop.f32.mrf.mxu0  ;;  %v263_v17 = vmul.f32 %v205_v8, %v205_v8  ;;  %v287_v59 = vadd.f32 %v286_v43, %v271_v44 }
  0xa4   :  { %v184_v13 = vpop.f32.mrf.mxu1 }
  0xa5   :  { %v247_v16 = vand.u32 2147483647, %v231_v10  ;;  %v224_v40 = vsub.f32 %v119_v11, %v184_v13  ;;  %v256_v49 = vmul.f32 %v184_v13, %v184_v13  ;;  %v315_v10 = vld [vmem:[%s3177_s2 + $0xf8] sm:$0xff] }
  0xa6   :  { %2019 = vmatmul.msk.f32.gmra.mxu2 %vm41_vm0, %v312_v12  ;;  %2051 = vmatmul.msk.f32.gmra.mxu0 %vm41_vm0, %v586_v29 }
  0xa7   :  { %v2503_v21 = vmul.f32 %v263_v17, %v247_v16  ;;  %2035 = vmatmul.msk.f32.gmra.mxu3 %vm41_vm0, %v312_v12  ;;  %v240_v47 = vand.u32 2147483647, %v224_v40 }
  0xa8   :  { %2067 = vmatmul.msk.f32.gmra.mxu1 %vm41_vm0, %v586_v29 }
  0xa9   :  { %v143_v23 = vpop.f32.mrf.mxu2  ;;  %v272_v60 = vmul.f32 %v256_v49, %v240_v47 }
  0xaa   :  { %v208_v28 = vpop.f32.mrf.mxu3 }
  0xab   :  { %v232_v30 = vsub.f32 %v143_v23, %v208_v28  ;;  %v122_v31 = vpop.f32.mrf.mxu0  ;;  %v264_v35 = vmul.f32 %v208_v28, %v208_v28  ;;  %v288_v6 = vadd.f32 %v287_v59, %v272_v60  ;;  %v848_v28 = vld [vmem:[%s3177_s2 + $0x180] sm:$0xff] }
  0xac   :  { %v187_v33 = vpop.f32.mrf.mxu1 }
  0xad   :  { %v248_v34 = vand.u32 2147483647, %v232_v30  ;;  %v225_v50 = vsub.f32 %v122_v31, %v187_v33  ;;  %v257_v62 = vmul.f32 %v187_v33, %v187_v33 }
  0xae   :  { %2020 = vmatmul.msk.f32.gmra.mxu2 %vm41_vm0, %v313_v32  ;;  %2052 = vmatmul.msk.f32.gmra.mxu0 %vm41_vm0, %v587_v46 }
  0xaf   :  { %v2515_v41 = vmul.f32 %v264_v35, %v248_v34  ;;  %2036 = vmatmul.msk.f32.gmra.mxu3 %vm41_vm0, %v313_v32  ;;  %v241_v61 = vand.u32 2147483647, %v225_v50 }
  0xb0   :  { %2068 = vmatmul.msk.f32.gmra.mxu1 %vm41_vm0, %v587_v46 }
  0xb1   :  { %v146_v42 = vpop.f32.mrf.mxu2  ;;  %v273_v7 = vmul.f32 %v257_v62, %v241_v61 }
  0xb2   :  { %v211_v45 = vpop.f32.mrf.mxu3 }
  0xb3   :  { %v233_v51 = vsub.f32 %v146_v42, %v211_v45  ;;  %v125_v52 = vpop.f32.mrf.mxu0  ;;  %v265_v56 = vmul.f32 %v211_v45, %v211_v45  ;;  %v289_v17 = vadd.f32 %v288_v6, %v273_v7 }
  0xb4   :  { %v190_v54 = vpop.f32.mrf.mxu1 }
  0xb5   :  { %v249_v55 = vand.u32 2147483647, %v233_v51  ;;  %v226_v57 = vsub.f32 %v125_v52, %v190_v54  ;;  %v258_v1 = vmul.f32 %v190_v54, %v190_v54  ;;  %v1123_v51 = vld [vmem:[%s3177_s2 + $0x208] sm:$0xff] }
  0xb6   :  { %2021 = vmatmul.msk.f32.gmra.mxu2 %vm41_vm0, %v314_v53  ;;  %2053 = vmatmul.msk.f32.gmra.mxu0 %vm41_vm0, %v588_v5 }
  0xb7   :  { %v281_v63 = vmul.f32 %v265_v56, %v249_v55  ;;  %2037 = vmatmul.msk.f32.gmra.mxu3 %vm41_vm0, %v314_v53  ;;  %v242_v0 = vand.u32 2147483647, %v226_v57  ;;  %v850_v53 = vld [vmem:[%s3177_s2 + $0x190] sm:$0xff] }
  0xb8   :  { %2069 = vmatmul.msk.f32.gmra.mxu1 %vm41_vm0, %v588_v5 }
  0xb9   :  { %v149_v2 = vpop.f32.mrf.mxu2  ;;  %v274_v11 = vmul.f32 %v258_v1, %v242_v0  ;;  %v1124_v0 = vld [vmem:[%s3177_s2 + $0x210] sm:$0xff] }
  0xba   :  { %v214_v3 = vpop.f32.mrf.mxu3 }
  0xbb   :  { %v234_v8 = vsub.f32 %v149_v2, %v214_v3  ;;  %v128_v9 = vpop.f32.mrf.mxu0  ;;  %v266_v14 = vmul.f32 %v214_v3, %v214_v3  ;;  %v290_v20 = vadd.f32 %v289_v17, %v274_v11  ;;  %v851_v2 = vld [vmem:[%s3177_s2 + $0x198] sm:$0xff] }
  0xbc   :  { %v193_v12 = vpop.f32.mrf.mxu1 }
  0xbd   :  { %v250_v13 = vand.u32 2147483647, %v234_v8  ;;  %v227_v15 = vsub.f32 %v128_v9, %v193_v12  ;;  %v259_v16 = vmul.f32 %v193_v12, %v193_v12  ;;  %v1125_v12 = vld [vmem:[%s3177_s2 + $0x218] sm:$0xff] }
  0xbe   :  { %2022 = vmatmul.msk.f32.gmra.mxu2 %vm41_vm0, %v315_v10  ;;  %2054 = vmatmul.msk.f32.gmra.mxu0 %vm41_vm0, %v589_v25 }
  0xbf   :  { %v282_v18 = vmul.f32 %v266_v14, %v250_v13  ;;  %v243_v19 = vand.u32 2147483647, %v227_v15  ;;  %2038 = vmatmul.msk.f32.gmra.mxu3 %vm41_vm0, %v315_v10  ;;  %v852_v14 = vld [vmem:[%s3177_s2 + $0x1a0] sm:$0xff] }
  0xc0   :  { %2070 = vmatmul.msk.f32.gmra.mxu1 %vm41_vm0, %v589_v25 }
  0xc1   :  { %v275_v22 = vmul.f32 %v259_v16, %v243_v19  ;;  %v152_v23 = vpop.f32.mrf.mxu2 }
  0xc2   :  { %v217_v24 = vpop.f32.mrf.mxu3 }
  0xc3   :  { %v291_v26 = vadd.f32 %v290_v20, %v275_v22  ;;  %v235_v27 = vsub.f32 %v152_v23, %v217_v24  ;;  %v267_v31 = vmul.f32 %v217_v24, %v217_v24  ;;  %v2550_v34 = vpop.f32.mrf.mxu0  ;;  %v1126_v24 = vld [vmem:[%s3177_s2 + $0x220] sm:$0xff] }
  0xc5   :  { %v292_v29 = vadd.f32 %v291_v26, %v2467_v48  ;;  %v251_v30 = vand.u32 2147483647, %v235_v27  ;;  %v2552_v35 = vpop.f32.mrf.mxu1  ;;  %v1122_v48 = vld [vmem:[%s3177_s2 + $0x200] sm:$0xff]  ;;  %v853_v26 = vld [vmem:[%s3177_s2 + $0x1a8] sm:$0xff] }
  0xc6   :  { %2071 = vmatmul.msk.f32.vlgmr.msra.gmra.mxu2 %vm41_vm0, %v848_v28  ;;  %2103 = vmatmul.msk.f32.vlgmr.msra.gmra.mxu0 %vm41_vm0, %v1122_v48 }
  0xc7   :  { %v293_v32 = vadd.f32 %v292_v29, %v2479_v58  ;;  %v283_v33 = vmul.f32 %v267_v31, %v251_v30  ;;  %2087 = vmatmul.msk.f32.vlgmr.msra.gmra.mxu3 %vm41_vm0, %v848_v28  ;;  %v849_v58 = vld [vmem:[%s3177_s2 + $0x188] sm:$0xff] }
  0xc8   :  { %2119 = vmatmul.msk.f32.vlgmr.msra.gmra.mxu1 %vm41_vm0, %v1122_v48  ;;  %v854_v48 = vld [vmem:[%s3177_s2 + $0x1b0] sm:$0xff] }
  0xc9   :  { %v294_v36 = vadd.f32 %v293_v32, %v2491_v4  ;;  %v381_v37 = vpop.f32.mrf.mxu2 }
  0xca   :  { %v446_v38 = vpop.f32.mrf.mxu3 }
  0xcb   :  { %v295_v39 = vadd.f32 %v294_v36, %v2503_v21  ;;  %v494_v40 = vsub.f32 %v381_v37, %v446_v38  ;;  %v526_v43 = vmul.f32 %v446_v38, %v446_v38  ;;  %v2567_v21 = vpop.f32.mrf.mxu0  ;;  %v1127_v37 = vld [vmem:[%s3177_s2 + $0x228] sm:$0xff] }
  0xcd   :  { %v296_v42 = vadd.f32 %v295_v39, %v2515_v41  ;;  %v510_v4 = vand.u32 2147483647, %v494_v40  ;;  %v2569_v46 = vpop.f32.mrf.mxu1 }
  0xce   :  { %2072 = vmatmul.msk.f32.gmra.mxu2 %vm41_vm0, %v849_v58  ;;  %2104 = vmatmul.msk.f32.gmra.mxu0 %vm41_vm0, %v1123_v51 }
  0xcf   :  { %v297_v44 = vadd.f32 %v296_v42, %v281_v63  ;;  %v542_v45 = vmul.f32 %v526_v43, %v510_v4  ;;  %2088 = vmatmul.msk.f32.gmra.mxu3 %vm41_vm0, %v849_v58 }
  0xd0   :  { %2120 = vmatmul.msk.f32.gmra.mxu1 %vm41_vm0, %v1123_v51 }
  0xd1   :  { %v298_v47 = vadd.f32 %v297_v44, %v282_v18  ;;  %v384_v49 = vpop.f32.mrf.mxu2 }
  0xd2   :  { %v449_v50 = vpop.f32.mrf.mxu3 }
  0xd3   :  { %v299_v41 = vadd.f32 %v298_v47, %v283_v33  ;;  %v495_v52 = vsub.f32 %v384_v49, %v449_v50  ;;  %v527_v56 = vmul.f32 %v449_v50, %v449_v50  ;;  %v2581_v59 = vpop.f32.mrf.mxu0  ;;  %v1128_v47 = vld [vmem:[%s3177_s2 + $0x230] sm:$0xff]  ;;  %v855_v50 = vld [vmem:[%s3177_s2 + $0x1b8] sm:$0xff] }
  0xd5   :  { %v558_v54 = vadd.f32 %v542_v45, %v299_v41  ;;  %v511_v55 = vand.u32 2147483647, %v495_v52  ;;  %v2583_v60 = vpop.f32.mrf.mxu1 }
  0xd6   :  { %2073 = vmatmul.msk.f32.gmra.mxu2 %vm41_vm0, %v850_v53  ;;  %2105 = vmatmul.msk.f32.gmra.mxu0 %vm41_vm0, %v1124_v0 }
  0xd7   :  { %v543_v57 = vmul.f32 %v527_v56, %v511_v55  ;;  %2089 = vmatmul.msk.f32.gmra.mxu3 %vm41_vm0, %v850_v53 }
  0xd8   :  { %2121 = vmatmul.msk.f32.gmra.mxu1 %vm41_vm0, %v1124_v0 }
  0xd9   :  { %v559_v61 = vadd.f32 %v558_v54, %v543_v57  ;;  %v387_v62 = vpop.f32.mrf.mxu2 }
  0xda   :  { %v452_v63 = vpop.f32.mrf.mxu3 }
  0xdb   :  { %v496_v1 = vsub.f32 %v387_v62, %v452_v63  ;;  %v528_v5 = vmul.f32 %v452_v63, %v452_v63  ;;  %v2595_v7 = vpop.f32.mrf.mxu0  ;;  %v856_v63 = vld [vmem:[%s3177_s2 + $0x1c0] sm:$0xff] }
  0xdd   :  { %v512_v3 = vand.u32 2147483647, %v496_v1  ;;  %v2597_v8 = vpop.f32.mrf.mxu1 }
  0xde   :  { %2074 = vmatmul.msk.f32.gmra.mxu2 %vm41_vm0, %v851_v2  ;;  %2106 = vmatmul.msk.f32.gmra.mxu0 %vm41_vm0, %v1125_v12 }
  0xdf   :  { %v544_v6 = vmul.f32 %v528_v5, %v512_v3  ;;  %2090 = vmatmul.msk.f32.gmra.mxu3 %vm41_vm0, %v851_v2 }
  0xe0   :  { %2122 = vmatmul.msk.f32.gmra.mxu1 %vm41_vm0, %v1125_v12 }
  0xe1   :  { %v560_v9 = vadd.f32 %v559_v61, %v544_v6  ;;  %v390_v10 = vpop.f32.mrf.mxu2  ;;  %v1129_v61 = vld [vmem:[%s3177_s2 + $0x238] sm:$0xff] }
  0xe2   :  { %v455_v11 = vpop.f32.mrf.mxu3 }
  0xe3   :  { %v497_v13 = vsub.f32 %v390_v10, %v455_v11  ;;  %v529_v16 = vmul.f32 %v455_v11, %v455_v11  ;;  %v2609_v18 = vpop.f32.mrf.mxu0  ;;  %v1130_v11 = vld [vmem:[%s3177_s2 + $0x240] sm:$0xff] }
  0xe5   :  { %v513_v15 = vand.u32 2147483647, %v497_v13  ;;  %v2611_v19 = vpop.f32.mrf.mxu1  ;;  %v857_v13 = vld [vmem:[%s3177_s2 + $0x1c8] sm:$0xff] }
  0xe6   :  { %2075 = vmatmul.msk.f32.gmra.mxu2 %vm41_vm0, %v852_v14  ;;  %2107 = vmatmul.msk.f32.gmra.mxu0 %vm41_vm0, %v1126_v24 }
  0xe7   :  { %v545_v17 = vmul.f32 %v529_v16, %v513_v15  ;;  %2091 = vmatmul.msk.f32.gmra.mxu3 %vm41_vm0, %v852_v14 }
  0xe8   :  { %2123 = vmatmul.msk.f32.gmra.mxu1 %vm41_vm0, %v1126_v24 }
  0xe9   :  { %v561_v20 = vadd.f32 %v560_v9, %v545_v17  ;;  %v393_v22 = vpop.f32.mrf.mxu2 }
  0xea   :  { %v458_v23 = vpop.f32.mrf.mxu3 }
  0xeb   :  { %v498_v25 = vsub.f32 %v393_v22, %v458_v23  ;;  %v530_v28 = vmul.f32 %v458_v23, %v458_v23  ;;  %v2623_v30 = vpop.f32.mrf.mxu0 }
  0xed   :  { %v514_v27 = vand.u32 2147483647, %v498_v25  ;;  %v2625_v31 = vpop.f32.mrf.mxu1  ;;  %v1131_v25 = vld [vmem:[%s3177_s2 + $0x248] sm:$0xff] }
  0xee   :  { %2076 = vmatmul.msk.f32.gmra.mxu2 %vm41_vm0, %v853_v26  ;;  %2108 = vmatmul.msk.f32.gmra.mxu0 %vm41_vm0, %v1127_v37 }
  0xef   :  { %v546_v29 = vmul.f32 %v530_v28, %v514_v27  ;;  %2092 = vmatmul.msk.f32.gmra.mxu3 %vm41_vm0, %v853_v26  ;;  %v858_v27 = vld [vmem:[%s3177_s2 + $0x1d0] sm:$0xff] }
  0xf0   :  { %2124 = vmatmul.msk.f32.gmra.mxu1 %vm41_vm0, %v1127_v37 }
  0xf1   :  { %v562_v32 = vadd.f32 %v561_v20, %v546_v29  ;;  %v396_v33 = vpop.f32.mrf.mxu2 }
  0xf2   :  { %v461_v36 = vpop.f32.mrf.mxu3 }
  0xf3   :  { %v499_v38 = vsub.f32 %v396_v33, %v461_v36  ;;  %v531_v40 = vmul.f32 %v461_v36, %v461_v36  ;;  %v2637_v42 = vpop.f32.mrf.mxu0 }
  0xf5   :  { %v515_v39 = vand.u32 2147483647, %v499_v38  ;;  %v2639_v4 = vpop.f32.mrf.mxu1 }
  0xf6   :  { %2077 = vmatmul.msk.f32.gmra.mxu2 %vm41_vm0, %v854_v48  ;;  %2109 = vmatmul.msk.f32.gmra.mxu0 %vm41_vm0, %v1128_v47 }
  0xf7   :  { %v547_v58 = vmul.f32 %v531_v40, %v515_v39  ;;  %2093 = vmatmul.msk.f32.gmra.mxu3 %vm41_vm0, %v854_v48  ;;  %v1132_v39 = vld [vmem:[%s3177_s2 + $0x250] sm:$0xff] }
  0xf8   :  { %2125 = vmatmul.msk.f32.gmra.mxu1 %vm41_vm0, %v1128_v47 }
  0xf9   :  { %v563_v43 = vadd.f32 %v562_v32, %v547_v58  ;;  %v399_v44 = vpop.f32.mrf.mxu2  ;;  %v859_v58 = vld [vmem:[%s3177_s2 + $0x1d8] sm:$0xff] }
  0xfa   :  { %v464_v45 = vpop.f32.mrf.mxu3 }
  0xfb   :  { %v500_v49 = vsub.f32 %v399_v44, %v464_v45  ;;  %v532_v41 = vmul.f32 %v464_v45, %v464_v45  ;;  %v2651_v53 = vpop.f32.mrf.mxu0 }
  0xfd   :  { %v516_v51 = vand.u32 2147483647, %v500_v49  ;;  %v2653_v54 = vpop.f32.mrf.mxu1 }
  0xfe   :  { %2078 = vmatmul.msk.f32.gmra.mxu2 %vm41_vm0, %v855_v50  ;;  %2110 = vmatmul.msk.f32.gmra.mxu0 %vm41_vm0, %v1129_v61 }
  0xff   :  { %v548_v52 = vmul.f32 %v532_v41, %v516_v51  ;;  %2094 = vmatmul.msk.f32.gmra.mxu3 %vm41_vm0, %v855_v50 }
 0x100   :  { %2126 = vmatmul.msk.f32.gmra.mxu1 %vm41_vm0, %v1129_v61 }
 0x101   :  { %v564_v55 = vadd.f32 %v563_v43, %v548_v52  ;;  %v402_v56 = vpop.f32.mrf.mxu2  ;;  %v1133_v52 = vld [vmem:[%s3177_s2 + $0x258] sm:$0xff] }
 0x102   :  { %v467_v57 = vpop.f32.mrf.mxu3 }
 0x103   :  { %v501_v62 = vsub.f32 %v402_v56, %v467_v57  ;;  %v533_v1 = vmul.f32 %v467_v57, %v467_v57  ;;  %v2665_v3 = vpop.f32.mrf.mxu0  ;;  %v860_v56 = vld [vmem:[%s3177_s2 + $0x1e0] sm:$0xff] }
 0x105   :  { %v517_v0 = vand.u32 2147483647, %v501_v62  ;;  %v2667_v5 = vpop.f32.mrf.mxu1 }
 0x106   :  { %2079 = vmatmul.msk.f32.gmra.mxu2 %vm41_vm0, %v856_v63  ;;  %2111 = vmatmul.msk.f32.gmra.mxu0 %vm41_vm0, %v1130_v11 }
 0x107   :  { %v549_v2 = vmul.f32 %v533_v1, %v517_v0  ;;  %2095 = vmatmul.msk.f32.gmra.mxu3 %vm41_vm0, %v856_v63 }
 0x108   :  { %2127 = vmatmul.msk.f32.gmra.mxu1 %vm41_vm0, %v1130_v11  ;;  %v861_v11 = vld [vmem:[%s3177_s2 + $0x1e8] sm:$0xff] }
 0x109   :  { %v565_v6 = vadd.f32 %v564_v55, %v549_v2  ;;  %v405_v9 = vpop.f32.mrf.mxu2 }
 0x10a   :  { %v470_v10 = vpop.f32.mrf.mxu3 }
 0x10b   :  { %v502_v12 = vsub.f32 %v405_v9, %v470_v10  ;;  %v534_v15 = vmul.f32 %v470_v10, %v470_v10  ;;  %v2679_v17 = vpop.f32.mrf.mxu0  ;;  %v1134_v9 = vld [vmem:[%s3177_s2 + $0x260] sm:$0xff] }
 0x10d   :  { %v518_v14 = vand.u32 2147483647, %v502_v12  ;;  %v2681_v20 = vpop.f32.mrf.mxu1 }
 0x10e   :  { %2080 = vmatmul.msk.f32.gmra.mxu2 %vm41_vm0, %v857_v13  ;;  %2112 = vmatmul.msk.f32.gmra.mxu0 %vm41_vm0, %v1131_v25 }
 0x10f   :  { %v550_v16 = vmul.f32 %v534_v15, %v518_v14  ;;  %2096 = vmatmul.msk.f32.gmra.mxu3 %vm41_vm0, %v857_v13 }
 0x110   :  { %2128 = vmatmul.msk.f32.gmra.mxu1 %vm41_vm0, %v1131_v25  ;;  %v1135_v25 = vld [vmem:[%s3177_s2 + $0x268] sm:$0xff] }
 0x111   :  { %v566_v22 = vadd.f32 %v565_v6, %v550_v16  ;;  %v408_v23 = vpop.f32.mrf.mxu2 }
 0x112   :  { %v473_v24 = vpop.f32.mrf.mxu3 }
 0x113   :  { %v503_v26 = vsub.f32 %v408_v23, %v473_v24  ;;  %v535_v29 = vmul.f32 %v473_v24, %v473_v24  ;;  %v2693_v33 = vpop.f32.mrf.mxu0 }
 0x115   :  { %v519_v28 = vand.u32 2147483647, %v503_v26  ;;  %v2695_v36 = vpop.f32.mrf.mxu1 }
 0x116   :  { %2081 = vmatmul.msk.f32.gmra.mxu2 %vm41_vm0, %v858_v27  ;;  %2113 = vmatmul.msk.f32.gmra.mxu0 %vm41_vm0, %v1132_v39 }
 0x117   :  { %v551_v32 = vmul.f32 %v535_v29, %v519_v28  ;;  %2097 = vmatmul.msk.f32.gmra.mxu3 %vm41_vm0, %v858_v27  ;;  %v862_v27 = vld [vmem:[%s3177_s2 + $0x1f0] sm:$0xff] }
 0x118   :  { %2129 = vmatmul.msk.f32.gmra.mxu1 %vm41_vm0, %v1132_v39 }
 0x119   :  { %v567_v37 = vadd.f32 %v566_v22, %v551_v32  ;;  %v411_v38 = vpop.f32.mrf.mxu2 }
 0x11a   :  { %v476_v48 = vpop.f32.mrf.mxu3 }
 0x11b   :  { %v504_v40 = vsub.f32 %v411_v38, %v476_v48  ;;  %v536_v44 = vmul.f32 %v476_v48, %v476_v48  ;;  %v2707_v47 = vpop.f32.mrf.mxu0 }
 0x11d   :  { %v520_v43 = vand.u32 2147483647, %v504_v40  ;;  %v2709_v49 = vpop.f32.mrf.mxu1 }
 0x11e   :  { %2082 = vmatmul.msk.f32.gmra.mxu2 %vm41_vm0, %v859_v58  ;;  %2114 = vmatmul.msk.f32.gmra.mxu0 %vm41_vm0, %v1133_v52 }
 0x11f   :  { %v552_v45 = vmul.f32 %v536_v44, %v520_v43  ;;  %2098 = vmatmul.msk.f32.gmra.mxu3 %vm41_vm0, %v859_v58  ;;  %v1136_v58 = vld [vmem:[%s3177_s2 + $0x270] sm:$0xff]  ;;  %v863_v44 = vld [vmem:[%s3177_s2 + $0x1f8] sm:$0xff] }
 0x120   :  { %2130 = vmatmul.msk.f32.gmra.mxu1 %vm41_vm0, %v1133_v52 }
 0x121   :  { %v568_v50 = vadd.f32 %v567_v37, %v552_v45  ;;  %v414_v51 = vpop.f32.mrf.mxu2 }
 0x122   :  { %v479_v41 = vpop.f32.mrf.mxu3 }
 0x123   :  { %v505_v55 = vsub.f32 %v414_v51, %v479_v41  ;;  %v537_v61 = vmul.f32 %v479_v41, %v479_v41  ;;  %v2721_v63 = vpop.f32.mrf.mxu0 }
 0x125   :  { %v521_v57 = vand.u32 2147483647, %v505_v55  ;;  %v2723_v0 = vpop.f32.mrf.mxu1  ;;  %v768_v55 = vsub.f32 %v2550_v34, %v2552_v35  ;;  %v770_v34 = vsub.f32 %v2581_v59, %v2583_v60  ;;  %v802_v59 = vmul.f32 %v2583_v60, %v2583_v60 }
 0x126   :  { %2083 = vmatmul.msk.f32.gmra.mxu2 %vm41_vm0, %v860_v56  ;;  %2115 = vmatmul.msk.f32.gmra.mxu0 %vm41_vm0, %v1134_v9 }
 0x127   :  { %v553_v62 = vmul.f32 %v537_v61, %v521_v57  ;;  %2099 = vmatmul.msk.f32.gmra.mxu3 %vm41_vm0, %v860_v56  ;;  %v769_v61 = vsub.f32 %v2567_v21, %v2569_v46  ;;  %v800_v21 = vmul.f32 %v2552_v35, %v2552_v35 }
 0x128   :  { %2131 = vmatmul.msk.f32.gmra.mxu1 %vm41_vm0, %v1134_v9  ;;  %v784_v9 = vand.u32 2147483647, %v768_v55  ;;  %v805_v55 = vmul.f32 %v2625_v31, %v2625_v31 }
 0x129   :  { %v569_v1 = vadd.f32 %v568_v50, %v553_v62  ;;  %v417_v2 = vpop.f32.mrf.mxu2 }
 0x12a   :  { %v482_v6 = vpop.f32.mrf.mxu3 }
 0x12b   :  { %v506_v10 = vsub.f32 %v417_v2, %v482_v6  ;;  %v538_v13 = vmul.f32 %v482_v6, %v482_v6  ;;  %v2735_v15 = vpop.f32.mrf.mxu0  ;;  %v1396_v6 = vld [vmem:[%s3177_s2 + $0x280] sm:$0xff] }
 0x12d   :  { %v522_v12 = vand.u32 2147483647, %v506_v10  ;;  %v2737_v16 = vpop.f32.mrf.mxu1 }
 0x12e   :  { %2084 = vmatmul.msk.f32.gmra.mxu2 %vm41_vm0, %v861_v11  ;;  %2116 = vmatmul.msk.f32.gmra.mxu0 %vm41_vm0, %v1135_v25 }
 0x12f   :  { %v554_v14 = vmul.f32 %v538_v13, %v522_v12  ;;  %2100 = vmatmul.msk.f32.gmra.mxu3 %vm41_vm0, %v861_v11  ;;  %v785_v12 = vand.u32 2147483647, %v769_v61  ;;  %v801_v13 = vmul.f32 %v2569_v46, %v2569_v46  ;;  %v772_v46 = vsub.f32 %v2609_v18, %v2611_v19  ;;  %v1397_v18 = vld [vmem:[%s3177_s2 + $0x288] sm:$0xff] }
 0x130   :  { %2132 = vmatmul.msk.f32.gmra.mxu1 %vm41_vm0, %v1135_v25  ;;  %v816_v25 = vmul.f32 %v800_v21, %v784_v9  ;;  %v777_v21 = vsub.f32 %v2679_v17, %v2681_v20 }
 0x131   :  { %v570_v22 = vadd.f32 %v569_v1, %v554_v14  ;;  %v420_v23 = vpop.f32.mrf.mxu2  ;;  %v1137_v1 = vld [vmem:[%s3177_s2 + $0x278] sm:$0xff]  ;;  %v771_v14 = vsub.f32 %v2595_v7, %v2597_v8  ;;  %v773_v7 = vsub.f32 %v2623_v30, %v2625_v31 }
 0x132   :  { %v485_v24 = vpop.f32.mrf.mxu3 }
 0x133   :  { %v507_v26 = vsub.f32 %v420_v23, %v485_v24  ;;  %v539_v29 = vmul.f32 %v485_v24, %v485_v24  ;;  %v2749_v37 = vpop.f32.mrf.mxu0  ;;  %v786_v23 = vand.u32 2147483647, %v770_v34  ;;  %v787_v60 = vand.u32 2147483647, %v771_v14 }
 0x135   :  { %v523_v28 = vand.u32 2147483647, %v507_v26  ;;  %v2751_v38 = vpop.f32.mrf.mxu1  ;;  %v818_v30 = vmul.f32 %v802_v59, %v786_v23  ;;  %v778_v23 = vsub.f32 %v2693_v33, %v2695_v36  ;;  %v810_v33 = vmul.f32 %v2695_v36, %v2695_v36 }
 0x136   :  { %2085 = vmatmul.msk.f32.gmra.mxu2 %vm41_vm0, %v862_v27  ;;  %2117 = vmatmul.msk.f32.gmra.mxu0 %vm41_vm0, %v1136_v58 }
 0x137   :  { %v555_v32 = vmul.f32 %v539_v29, %v523_v28  ;;  %2101 = vmatmul.msk.f32.gmra.mxu3 %vm41_vm0, %v862_v27  ;;  %v817_v28 = vmul.f32 %v801_v13, %v785_v12  ;;  %v807_v12 = vmul.f32 %v2653_v54, %v2653_v54 }
 0x138   :  { %2133 = vmatmul.msk.f32.gmra.mxu1 %vm41_vm0, %v1136_v58  ;;  %v804_v58 = vmul.f32 %v2611_v19, %v2611_v19 }
 0x139   :  { %v571_v48 = vadd.f32 %v570_v22, %v555_v32  ;;  %v423_v39 = vpop.f32.mrf.mxu2  ;;  %v1670_v32 = vld [vmem:[%s3177_s2 + $0x300] sm:$0xff] }
 0x13a   :  { %v488_v40 = vpop.f32.mrf.mxu3 }
 0x13b   :  { %v508_v43 = vsub.f32 %v423_v39, %v488_v40  ;;  %v540_v50 = vmul.f32 %v488_v40, %v488_v40  ;;  %v2763_v41 = vpop.f32.mrf.mxu0 }
 0x13d   :  { %v524_v45 = vand.u32 2147483647, %v508_v43  ;;  %v2765_v52 = vpop.f32.mrf.mxu1  ;;  %v774_v43 = vsub.f32 %v2637_v42, %v2639_v4  ;;  %v806_v42 = vmul.f32 %v2639_v4, %v2639_v4 }
 0x13e   :  { %2086 = vmatmul.msk.f32.gmra.mxu2 %vm41_vm0, %v863_v44  ;;  %2118 = vmatmul.msk.f32.gmra.mxu0 %vm41_vm0, %v1137_v1 }
 0x13f   :  { %v556_v51 = vmul.f32 %v540_v50, %v524_v45  ;;  %2102 = vmatmul.msk.f32.gmra.mxu3 %vm41_vm0, %v863_v44  ;;  %v788_v44 = vand.u32 2147483647, %v772_v46  ;;  %v790_v19 = vand.u32 2147483647, %v774_v43  ;;  %v1672_v43 = vld [vmem:[%s3177_s2 + $0x310] sm:$0xff] }
 0x140   :  { %2134 = vmatmul.msk.f32.gmra.mxu1 %vm41_vm0, %v1137_v1 }
 0x141   :  { %v572_v56 = vadd.f32 %v571_v48, %v556_v51  ;;  %v426_v57 = vpop.f32.mrf.mxu2  ;;  %v803_v48 = vmul.f32 %v2597_v8, %v2597_v8  ;;  %v789_v51 = vand.u32 2147483647, %v773_v7  ;;  %v820_v31 = vmul.f32 %v804_v58, %v788_v44 }
 0x142   :  { %v491_v62 = vpop.f32.mrf.mxu3  ;;  %v822_v17 = vmul.f32 %v806_v42, %v790_v19  ;;  %v779_v7 = vsub.f32 %v2707_v47, %v2709_v49  ;;  %v813_v19 = vmul.f32 %v2737_v16, %v2737_v16 }
 0x143   :  { %v509_v2 = vsub.f32 %v426_v57, %v491_v62  ;;  %v541_v11 = vmul.f32 %v491_v62, %v491_v62  ;;  %v2791_v24 = vpop.f32.mrf.mxu0  ;;  %v775_v57 = vsub.f32 %v2651_v53, %v2653_v54  ;;  %v821_v53 = vmul.f32 %v805_v55, %v789_v51 }
 0x144   :  { %v795_v36 = vand.u32 2147483647, %v779_v7  ;;  %v812_v51 = vmul.f32 %v2723_v0, %v2723_v0 }
 0x145   :  { %v525_v10 = vand.u32 2147483647, %v509_v2  ;;  %v2793_v35 = vpop.f32.mrf.mxu1  ;;  %v791_v4 = vand.u32 2147483647, %v775_v57 }
 0x146   :  { %2135 = vmatmul.msk.f32.vlgmr.msrb.gmra.mxu2 %vm41_vm0, %v1396_v6  ;;  %2167 = vmatmul.msk.f32.vlgmr.msrb.gmra.mxu0 %vm41_vm0, %v1670_v32 }
 0x147   :  { %v557_v22 = vmul.f32 %v541_v11, %v525_v10  ;;  %2151 = vmatmul.msk.f32.vlgmr.msrb.gmra.mxu3 %vm41_vm0, %v1396_v6  ;;  %v776_v6 = vsub.f32 %v2665_v3, %v2667_v5  ;;  %v1671_v11 = vld [vmem:[%s3177_s2 + $0x308] sm:$0xff]  ;;  %v1398_v3 = vld [vmem:[%s3177_s2 + $0x290] sm:$0xff] }
 0x148   :  { %2183 = vmatmul.msk.f32.vlgmr.msrb.gmra.mxu1 %vm41_vm0, %v1670_v32 }
 0x149   :  { %v573_v26 = vadd.f32 %v572_v56, %v557_v22  ;;  %v929_v27 = vpop.f32.mrf.mxu2  ;;  %v819_v56 = vmul.f32 %v803_v48, %v787_v60  ;;  %v808_v22 = vmul.f32 %v2667_v5, %v2667_v5  ;;  %v792_v59 = vand.u32 2147483647, %v776_v6 }
 0x14a   :  { %v994_v29 = vpop.f32.mrf.mxu3  ;;  %v794_v5 = vand.u32 2147483647, %v778_v23  ;;  %v780_v60 = vsub.f32 %v2721_v63, %v2723_v0  ;;  %v811_v63 = vmul.f32 %v2709_v49, %v2709_v49  ;;  %v783_v0 = vsub.f32 %v2763_v41, %v2765_v52 }
 0x14b   :  { %v832_v39 = vadd.f32 %v816_v25, %v573_v26  ;;  %v1042_v40 = vsub.f32 %v929_v27, %v994_v29  ;;  %v1074_v50 = vmul.f32 %v994_v29, %v994_v29  ;;  %v2823_v1 = vpop.f32.mrf.mxu0  ;;  %v793_v26 = vand.u32 2147483647, %v777_v21 }
 0x14c   :  { %v809_v27 = vmul.f32 %v2681_v20, %v2681_v20  ;;  %v827_v42 = vmul.f32 %v811_v63, %v795_v36  ;;  %v815_v41 = vmul.f32 %v2765_v52, %v2765_v52 }
 0x14d   :  { %v833_v45 = vadd.f32 %v832_v39, %v817_v28  ;;  %v1058_v8 = vand.u32 2147483647, %v1042_v40  ;;  %v2825_v2 = vpop.f32.mrf.mxu1  ;;  %v823_v28 = vmul.f32 %v807_v12, %v791_v4  ;;  %v824_v39 = vmul.f32 %v808_v22, %v792_v59  ;;  %v1673_v12 = vld [vmem:[%s3177_s2 + $0x318] sm:$0xff] }
 0x14e   :  { %2136 = vmatmul.msk.f32.gmra.mxu2 %vm41_vm0, %v1397_v18  ;;  %2168 = vmatmul.msk.f32.gmra.mxu0 %vm41_vm0, %v1671_v11  ;;  %v825_v47 = vmul.f32 %v809_v27, %v793_v26 }
 0x14f   :  { %v834_v61 = vadd.f32 %v833_v45, %v818_v30  ;;  %v2818_v62 = vmul.f32 %v1074_v50, %v1058_v8  ;;  %2152 = vmatmul.msk.f32.gmra.mxu3 %vm41_vm0, %v1397_v18  ;;  %v781_v30 = vsub.f32 %v2735_v15, %v2737_v16  ;;  %v1399_v8 = vld [vmem:[%s3177_s2 + $0x298] sm:$0xff]  ;;  %v826_v15 = vmul.f32 %v810_v33, %v794_v5 }
 0x150   :  { %2184 = vmatmul.msk.f32.gmra.mxu1 %vm41_vm0, %v1671_v11  ;;  %v796_v50 = vand.u32 2147483647, %v780_v60  ;;  %v814_v16 = vmul.f32 %v2751_v38, %v2751_v38  ;;  %v1401_v60 = vld [vmem:[%s3177_s2 + $0x2a8] sm:$0xff] }
 0x151   :  { %v835_v34 = vadd.f32 %v834_v61, %v819_v56  ;;  %v932_v9 = vpop.f32.mrf.mxu2  ;;  %v782_v56 = vsub.f32 %v2749_v37, %v2751_v38  ;;  %v797_v61 = vand.u32 2147483647, %v781_v30 }
 0x152   :  { %v997_v10 = vpop.f32.mrf.mxu3  ;;  %v828_v37 = vmul.f32 %v812_v51, %v796_v50 }
 0x153   :  { %v836_v13 = vadd.f32 %v835_v34, %v820_v31  ;;  %v1043_v14 = vsub.f32 %v932_v9, %v997_v10  ;;  %v1075_v46 = vmul.f32 %v997_v10, %v997_v10  ;;  %v2857_v48 = vpop.f32.mrf.mxu0  ;;  %v798_v21 = vand.u32 2147483647, %v782_v56 }
 0x154   :  { %v829_v11 = vmul.f32 %v813_v19, %v797_v61  ;;  %v1676_v19 = vld [vmem:[%s3177_s2 + $0x330] sm:$0xff] }
 0x155   :  { %v837_v25 = vadd.f32 %v836_v13, %v821_v53  ;;  %v1059_v54 = vand.u32 2147483647, %v1043_v14  ;;  %v2859_v20 = vpop.f32.mrf.mxu1  ;;  %v799_v14 = vand.u32 2147483647, %v783_v0  ;;  %v830_v22 = vmul.f32 %v814_v16, %v798_v21 }
 0x156   :  { %2137 = vmatmul.msk.f32.gmra.mxu2 %vm41_vm0, %v1398_v3  ;;  %2169 = vmatmul.msk.f32.gmra.mxu0 %vm41_vm0, %v1672_v43 }
 0x157   :  { %v838_v29 = vadd.f32 %v837_v25, %v822_v17  ;;  %v2850_v32 = vmul.f32 %v1075_v46, %v1059_v54  ;;  %2153 = vmatmul.msk.f32.gmra.mxu3 %vm41_vm0, %v1398_v3  ;;  %v1400_v17 = vld [vmem:[%s3177_s2 + $0x2a0] sm:$0xff]  ;;  %v831_v54 = vmul.f32 %v815_v41, %v799_v14 }
 0x158   :  { %2185 = vmatmul.msk.f32.gmra.mxu1 %vm41_vm0, %v1672_v43 }
 0x159   :  { %v839_v40 = vadd.f32 %v838_v29, %v823_v28  ;;  %v935_v18 = vpop.f32.mrf.mxu2  ;;  %v1674_v29 = vld [vmem:[%s3177_s2 + $0x320] sm:$0xff] }
 0x15a   :  { %v1000_v58 = vpop.f32.mrf.mxu3 }
 0x15b   :  { %v840_v44 = vadd.f32 %v839_v40, %v824_v39  ;;  %v1044_v45 = vsub.f32 %v935_v18, %v1000_v58  ;;  %v1076_v57 = vmul.f32 %v1000_v58, %v1000_v58  ;;  %v2883_v34 = vpop.f32.mrf.mxu0 }
 0x15d   :  { %v841_v55 = vadd.f32 %v840_v44, %v825_v47  ;;  %v1060_v49 = vand.u32 2147483647, %v1044_v45  ;;  %v2885_v9 = vpop.f32.mrf.mxu1  ;;  %v1675_v44 = vld [vmem:[%s3177_s2 + $0x328] sm:$0xff] }
 0x15e   :  { %2138 = vmatmul.msk.f32.gmra.mxu2 %vm41_vm0, %v1399_v8  ;;  %2170 = vmatmul.msk.f32.gmra.mxu0 %vm41_vm0, %v1673_v12 }
 0x15f   :  { %v842_v31 = vadd.f32 %v841_v55, %v826_v15  ;;  %v1092_v6 = vmul.f32 %v1076_v57, %v1060_v49  ;;  %2154 = vmatmul.msk.f32.gmra.mxu3 %vm41_vm0, %v1399_v8  ;;  %v1402_v8 = vld [vmem:[%s3177_s2 + $0x2b0] sm:$0xff] }
 0x160   :  { %2186 = vmatmul.msk.f32.gmra.mxu1 %vm41_vm0, %v1673_v12 }
 0x161   :  { %v843_v53 = vadd.f32 %v842_v31, %v827_v42  ;;  %v938_v10 = vpop.f32.mrf.mxu2  ;;  %v1403_v31 = vld [vmem:[%s3177_s2 + $0x2b8] sm:$0xff] }
 0x162   :  { %v1003_v4 = vpop.f32.mrf.mxu3 }
 0x163   :  { %v844_v13 = vadd.f32 %v843_v53, %v828_v37  ;;  %v1045_v3 = vsub.f32 %v938_v10, %v1003_v4  ;;  %v1077_v59 = vmul.f32 %v1003_v4, %v1003_v4  ;;  %v2901_v52 = vpop.f32.mrf.mxu0  ;;  %v1677_v4 = vld [vmem:[%s3177_s2 + $0x338] sm:$0xff] }
 0x165   :  { %v845_v38 = vadd.f32 %v844_v13, %v829_v11  ;;  %v1061_v23 = vand.u32 2147483647, %v1045_v3  ;;  %v2903_v26 = vpop.f32.mrf.mxu1  ;;  %v1404_v13 = vld [vmem:[%s3177_s2 + $0x2c0] sm:$0xff] }
 0x166   :  { %2139 = vmatmul.msk.f32.gmra.mxu2 %vm41_vm0, %v1400_v17  ;;  %2171 = vmatmul.msk.f32.gmra.mxu0 %vm41_vm0, %v1674_v29 }
 0x167   :  { %v846_v25 = vadd.f32 %v845_v38, %v830_v22  ;;  %v1093_v46 = vmul.f32 %v1077_v59, %v1061_v23  ;;  %2155 = vmatmul.msk.f32.gmra.mxu3 %vm41_vm0, %v1400_v17 }
 0x168   :  { %2187 = vmatmul.msk.f32.gmra.mxu1 %vm41_vm0, %v1674_v29 }
 0x169   :  { %v847_v27 = vadd.f32 %v846_v25, %v831_v54  ;;  %v941_v28 = vpop.f32.mrf.mxu2 }
 0x16a   :  { %v1006_v7 = vpop.f32.mrf.mxu3 }
 0x16b   :  { %v1106_v5 = vadd.f32 %v2818_v62, %v847_v27  ;;  %v1046_v33 = vsub.f32 %v941_v28, %v1006_v7  ;;  %v1078_v18 = vmul.f32 %v1006_v7, %v1006_v7  ;;  %v2917_v62 = vpop.f32.mrf.mxu0  ;;  %v1405_v28 = vld [vmem:[%s3177_s2 + $0x2c8] sm:$0xff] }
 0x16d   :  { %v1107_v39 = vadd.f32 %v1106_v5, %v2850_v32  ;;  %v1062_v40 = vand.u32 2147483647, %v1046_v33  ;;  %v2919_v58 = vpop.f32.mrf.mxu1 }
 0x16e   :  { %2140 = vmatmul.msk.f32.gmra.mxu2 %vm41_vm0, %v1401_v60  ;;  %2172 = vmatmul.msk.f32.gmra.mxu0 %vm41_vm0, %v1675_v44 }
 0x16f   :  { %v1108_v47 = vadd.f32 %v1107_v39, %v1092_v6  ;;  %v1094_v30 = vmul.f32 %v1078_v18, %v1062_v40  ;;  %2156 = vmatmul.msk.f32.gmra.mxu3 %vm41_vm0, %v1401_v60 }
 0x170   :  { %2188 = vmatmul.msk.f32.gmra.mxu1 %vm41_vm0, %v1675_v44 }
 0x171   :  { %v1109_v43 = vadd.f32 %v1108_v47, %v1093_v46  ;;  %v944_v36 = vpop.f32.mrf.mxu2  ;;  %v1678_v46 = vld [vmem:[%s3177_s2 + $0x340] sm:$0xff] }
 0x172   :  { %v1009_v63 = vpop.f32.mrf.mxu3 }
 0x173   :  { %v1110_v32 = vadd.f32 %v1109_v43, %v1094_v30  ;;  %v1047_v45 = vsub.f32 %v944_v36, %v1009_v63  ;;  %v1079_v50 = vmul.f32 %v1009_v63, %v1009_v63  ;;  %v2931_v55 = vpop.f32.mrf.mxu0  ;;  %v1679_v63 = vld [vmem:[%s3177_s2 + $0x348] sm:$0xff] }
 0x175   :  { %v1063_v15 = vand.u32 2147483647, %v1047_v45  ;;  %v2933_v56 = vpop.f32.mrf.mxu1 }
 0x176   :  { %2141 = vmatmul.msk.f32.gmra.mxu2 %vm41_vm0, %v1402_v8  ;;  %2173 = vmatmul.msk.f32.gmra.mxu0 %vm41_vm0, %v1676_v19 }
 0x177   :  { %v1095_v51 = vmul.f32 %v1079_v50, %v1063_v15  ;;  %2157 = vmatmul.msk.f32.gmra.mxu3 %vm41_vm0, %v1402_v8 }
 0x178   :  { %2189 = vmatmul.msk.f32.gmra.mxu1 %vm41_vm0, %v1676_v19 }
 0x179   :  { %v1111_v49 = vadd.f32 %v1110_v32, %v1095_v51  ;;  %v947_v57 = vpop.f32.mrf.mxu2  ;;  %v1406_v32 = vld [vmem:[%s3177_s2 + $0x2d0] sm:$0xff] }
 0x17a   :  { %v1012_v61 = vpop.f32.mrf.mxu3 }
 0x17b   :  { %v1048_v42 = vsub.f32 %v947_v57, %v1012_v61  ;;  %v1080_v0 = vmul.f32 %v1012_v61, %v1012_v61  ;;  %v2945_v53 = vpop.f32.mrf.mxu0 }
 0x17d   :  { %v1064_v6 = vand.u32 2147483647, %v1048_v42  ;;  %v2947_v21 = vpop.f32.mrf.mxu1 }
 0x17e   :  { %2142 = vmatmul.msk.f32.gmra.mxu2 %vm41_vm0, %v1403_v31  ;;  %2174 = vmatmul.msk.f32.gmra.mxu0 %vm41_vm0, %v1677_v4 }
 0x17f   :  { %v1096_v37 = vmul.f32 %v1080_v0, %v1064_v6  ;;  %2158 = vmatmul.msk.f32.gmra.mxu3 %vm41_vm0, %v1403_v31  ;;  %v1680_v0 = vld [vmem:[%s3177_s2 + $0x350] sm:$0xff] }
 0x180   :  { %2190 = vmatmul.msk.f32.gmra.mxu1 %vm41_vm0, %v1677_v4 }
 0x181   :  { %v1112_v16 = vadd.f32 %v1111_v49, %v1096_v37  ;;  %v950_v10 = vpop.f32.mrf.mxu2 }
 0x182   :  { %v1015_v11 = vpop.f32.mrf.mxu3 }
 0x183   :  { %v1049_v12 = vsub.f32 %v950_v10, %v1015_v11  ;;  %v1081_v41 = vmul.f32 %v1015_v11, %v1015_v11  ;;  %v1227_v17 = vpop.f32.mrf.mxu0 }
 0x185   :  { %v1065_v14 = vand.u32 2147483647, %v1049_v12  ;;  %v1292_v38 = vpop.f32.mrf.mxu1 }
 0x186   :  { %2143 = vmatmul.msk.f32.gmra.mxu2 %vm41_vm0, %v1404_v13  ;;  %v1324_v59 = vsub.f32 %v1227_v17, %v1292_v38  ;;  %v1356_v25 = vmul.f32 %v1292_v38, %v1292_v38  ;;  %2175 = vmatmul.msk.f32.gmra.mxu0 %vm41_vm0, %v1678_v46 }
 0x187   :  { %v1097_v3 = vmul.f32 %v1081_v41, %v1065_v14  ;;  %2159 = vmatmul.msk.f32.gmra.mxu3 %vm41_vm0, %v1404_v13 }
 0x188   :  { %v1340_v7 = vand.u32 2147483647, %v1324_v59  ;;  %2191 = vmatmul.msk.f32.gmra.mxu1 %vm41_vm0, %v1678_v46  ;;  %v1681_v59 = vld [vmem:[%s3177_s2 + $0x358] sm:$0xff] }
 0x189   :  { %v1113_v22 = vadd.f32 %v1112_v16, %v1097_v3  ;;  %v953_v23 = vpop.f32.mrf.mxu2  ;;  %v1407_v16 = vld [vmem:[%s3177_s2 + $0x2d8] sm:$0xff] }
 0x18a   :  { %v1018_v54 = vpop.f32.mrf.mxu3  ;;  %v2967_v33 = vmul.f32 %v1356_v25, %v1340_v7 }
 0x18b   :  { %v1050_v27 = vsub.f32 %v953_v23, %v1018_v54  ;;  %v1082_v5 = vmul.f32 %v1018_v54, %v1018_v54  ;;  %v1230_v39 = vpop.f32.mrf.mxu0  ;;  %v1408_v54 = vld [vmem:[%s3177_s2 + $0x2e0] sm:$0xff] }
 0x18d   :  { %v1066_v29 = vand.u32 2147483647, %v1050_v27  ;;  %v1295_v40 = vpop.f32.mrf.mxu1 }
 0x18e   :  { %2144 = vmatmul.msk.f32.gmra.mxu2 %vm41_vm0, %v1405_v28  ;;  %v1325_v30 = vsub.f32 %v1230_v39, %v1295_v40  ;;  %v1357_v43 = vmul.f32 %v1295_v40, %v1295_v40  ;;  %2176 = vmatmul.msk.f32.gmra.mxu0 %vm41_vm0, %v1679_v63 }
 0x18f   :  { %v1098_v60 = vmul.f32 %v1082_v5, %v1066_v29  ;;  %2160 = vmatmul.msk.f32.gmra.mxu3 %vm41_vm0, %v1405_v28 }
 0x190   :  { %v1341_v45 = vand.u32 2147483647, %v1325_v30  ;;  %2192 = vmatmul.msk.f32.gmra.mxu1 %vm41_vm0, %v1679_v63  ;;  %v1682_v30 = vld [vmem:[%s3177_s2 + $0x360] sm:$0xff] }
 0x191   :  { %v1114_v18 = vadd.f32 %v1113_v22, %v1098_v60  ;;  %v956_v47 = vpop.f32.mrf.mxu2 }
 0x192   :  { %v1021_v36 = vpop.f32.mrf.mxu3  ;;  %v2979_v50 = vmul.f32 %v1357_v43, %v1341_v45 }
 0x193   :  { %v1051_v44 = vsub.f32 %v956_v47, %v1021_v36  ;;  %v1083_v15 = vmul.f32 %v1021_v36, %v1021_v36  ;;  %v1233_v49 = vpop.f32.mrf.mxu0  ;;  %v1409_v36 = vld [vmem:[%s3177_s2 + $0x2e8] sm:$0xff] }
 0x195   :  { %v1067_v8 = vand.u32 2147483647, %v1051_v44  ;;  %v1298_v57 = vpop.f32.mrf.mxu1 }
 0x196   :  { %2145 = vmatmul.msk.f32.gmra.mxu2 %vm41_vm0, %v1406_v32  ;;  %v1326_v42 = vsub.f32 %v1233_v49, %v1298_v57  ;;  %v1358_v31 = vmul.f32 %v1298_v57, %v1298_v57  ;;  %2177 = vmatmul.msk.f32.gmra.mxu0 %vm41_vm0, %v1680_v0 }
 0x197   :  { %v1099_v51 = vmul.f32 %v1083_v15, %v1067_v8  ;;  %2161 = vmatmul.msk.f32.gmra.mxu3 %vm41_vm0, %v1406_v32 }
 0x198   :  { %v1342_v10 = vand.u32 2147483647, %v1326_v42  ;;  %2193 = vmatmul.msk.f32.gmra.mxu1 %vm41_vm0, %v1680_v0  ;;  %v1410_v0 = vld [vmem:[%s3177_s2 + $0x2f0] sm:$0xff] }
 0x199   :  { %v1115_v61 = vadd.f32 %v1114_v18, %v1099_v51  ;;  %v959_v19 = vpop.f32.mrf.mxu2 }
 0x19a   :  { %v1024_v6 = vpop.f32.mrf.mxu3  ;;  %v2991_v12 = vmul.f32 %v1358_v31, %v1342_v10  ;;  %v1683_v31 = vld [vmem:[%s3177_s2 + $0x368] sm:$0xff] }
 0x19b   :  { %v1052_v37 = vsub.f32 %v959_v19, %v1024_v6  ;;  %v1084_v4 = vmul.f32 %v1024_v6, %v1024_v6  ;;  %v1236_v14 = vpop.f32.mrf.mxu0 }
 0x19d   :  { %v1068_v11 = vand.u32 2147483647, %v1052_v37  ;;  %v1301_v41 = vpop.f32.mrf.mxu1 }
 0x19e   :  { %2146 = vmatmul.msk.f32.gmra.mxu2 %vm41_vm0, %v1407_v16  ;;  %v1327_v38 = vsub.f32 %v1236_v14, %v1301_v41  ;;  %v1359_v22 = vmul.f32 %v1301_v41, %v1301_v41  ;;  %2178 = vmatmul.msk.f32.gmra.mxu0 %vm41_vm0, %v1681_v59 }
 0x19f   :  { %v1100_v13 = vmul.f32 %v1084_v4, %v1068_v11  ;;  %2162 = vmatmul.msk.f32.gmra.mxu3 %vm41_vm0, %v1407_v16 }
 0x1a0   :  { %v1343_v46 = vand.u32 2147483647, %v1327_v38  ;;  %2194 = vmatmul.msk.f32.gmra.mxu1 %vm41_vm0, %v1681_v59 }
 0x1a1   :  { %v1116_v3 = vadd.f32 %v1115_v61, %v1100_v13  ;;  %v962_v17 = vpop.f32.mrf.mxu2 }
 0x1a2   :  { %v1027_v23 = vpop.f32.mrf.mxu3  ;;  %v3003_v7 = vmul.f32 %v1359_v22, %v1343_v46 }
 0x1a3   :  { %v1053_v25 = vsub.f32 %v962_v17, %v1027_v23  ;;  %v1085_v28 = vmul.f32 %v1027_v23, %v1027_v23  ;;  %v1239_v5 = vpop.f32.mrf.mxu0  ;;  %v1684_v23 = vld [vmem:[%s3177_s2 + $0x370] sm:$0xff] }
 0x1a5   :  { %v1069_v27 = vand.u32 2147483647, %v1053_v25  ;;  %v1304_v60 = vpop.f32.mrf.mxu1  ;;  %v1411_v25 = vld [vmem:[%s3177_s2 + $0x2f8] sm:$0xff] }
 0x1a6   :  { %2147 = vmatmul.msk.f32.gmra.mxu2 %vm41_vm0, %v1408_v54  ;;  %v1328_v18 = vsub.f32 %v1239_v5, %v1304_v60  ;;  %v1360_v44 = vmul.f32 %v1304_v60, %v1304_v60  ;;  %2179 = vmatmul.msk.f32.gmra.mxu0 %vm41_vm0, %v1682_v30  ;;  %v1316_v60 = vsub.f32 %v2791_v24, %v2793_v35 }
 0x1a7   :  { %v1101_v29 = vmul.f32 %v1085_v28, %v1069_v27  ;;  %2163 = vmatmul.msk.f32.gmra.mxu3 %vm41_vm0, %v1408_v54 }
 0x1a8   :  { %v1344_v63 = vand.u32 2147483647, %v1328_v18  ;;  %2195 = vmatmul.msk.f32.gmra.mxu1 %vm41_vm0, %v1682_v30  ;;  %v1332_v24 = vand.u32 2147483647, %v1316_v60  ;;  %v1323_v60 = vsub.f32 %v2945_v53, %v2947_v21 }
 0x1a9   :  { %v1117_v39 = vadd.f32 %v1116_v3, %v1101_v29  ;;  %v965_v40 = vpop.f32.mrf.mxu2 }
 0x1aa   :  { %v1030_v47 = vpop.f32.mrf.mxu3  ;;  %v3015_v8 = vmul.f32 %v1360_v44, %v1344_v63  ;;  %v1685_v63 = vld [vmem:[%s3177_s2 + $0x378] sm:$0xff] }
 0x1ab   :  { %v1054_v43 = vsub.f32 %v965_v40, %v1030_v47  ;;  %v1086_v45 = vmul.f32 %v1030_v47, %v1030_v47  ;;  %v1242_v51 = vpop.f32.mrf.mxu0 }
 0x1ad   :  { %v1070_v32 = vand.u32 2147483647, %v1054_v43  ;;  %v1307_v49 = vpop.f32.mrf.mxu1  ;;  %v1317_v43 = vsub.f32 %v2823_v1, %v2825_v2 }
 0x1ae   :  { %2148 = vmatmul.msk.f32.gmra.mxu2 %vm41_vm0, %v1409_v36  ;;  %v1329_v19 = vsub.f32 %v1242_v51, %v1307_v49  ;;  %v1361_v16 = vmul.f32 %v1307_v49, %v1307_v49  ;;  %2180 = vmatmul.msk.f32.gmra.mxu0 %vm41_vm0, %v1683_v31  ;;  %v1348_v51 = vmul.f32 %v2793_v35, %v2793_v35 }
 0x1af   :  { %v1102_v15 = vmul.f32 %v1086_v45, %v1070_v32  ;;  %2164 = vmatmul.msk.f32.gmra.mxu3 %vm41_vm0, %v1409_v36 }
 0x1b0   :  { %v1345_v37 = vand.u32 2147483647, %v1329_v19  ;;  %2196 = vmatmul.msk.f32.gmra.mxu1 %vm41_vm0, %v1683_v31  ;;  %v1349_v19 = vmul.f32 %v2825_v2, %v2825_v2  ;;  %v1351_v2 = vmul.f32 %v2885_v9, %v2885_v9 }
 0x1b1   :  { %v1118_v57 = vadd.f32 %v1117_v39, %v1102_v15  ;;  %v968_v61 = vpop.f32.mrf.mxu2  ;;  %v1318_v15 = vsub.f32 %v2857_v48, %v2859_v20  ;;  %v1320_v48 = vsub.f32 %v2901_v52, %v2903_v26 }
 0x1b2   :  { %v1033_v42 = vpop.f32.mrf.mxu3  ;;  %v3027_v4 = vmul.f32 %v1361_v16, %v1345_v37  ;;  %v1364_v16 = vmul.f32 %v1348_v51, %v1332_v24 }
 0x1b3   :  { %v1055_v6 = vsub.f32 %v968_v61, %v1033_v42  ;;  %v1087_v11 = vmul.f32 %v1033_v42, %v1033_v42  ;;  %v1245_v14 = vpop.f32.mrf.mxu0  ;;  %v1333_v61 = vand.u32 2147483647, %v1317_v43  ;;  %v1319_v42 = vsub.f32 %v2883_v34, %v2885_v9 }
 0x1b4   :  { %v1321_v34 = vsub.f32 %v2917_v62, %v2919_v58  ;;  %v1336_v52 = vand.u32 2147483647, %v1320_v48  ;;  %v1353_v62 = vmul.f32 %v2919_v58, %v2919_v58 }
 0x1b5   :  { %v1071_v10 = vand.u32 2147483647, %v1055_v6  ;;  %v1310_v41 = vpop.f32.mrf.mxu1  ;;  %v1334_v6 = vand.u32 2147483647, %v1318_v15 }
 0x1b6   :  { %2149 = vmatmul.msk.f32.gmra.mxu2 %vm41_vm0, %v1410_v0  ;;  %v1330_v38 = vsub.f32 %v1245_v14, %v1310_v41  ;;  %v1362_v46 = vmul.f32 %v1310_v41, %v1310_v41  ;;  %2181 = vmatmul.msk.f32.gmra.mxu0 %vm41_vm0, %v1684_v23  ;;  %v1365_v14 = vmul.f32 %v1349_v19, %v1333_v61 }
 0x1b7   :  { %v1103_v13 = vmul.f32 %v1087_v11, %v1071_v10  ;;  %2165 = vmatmul.msk.f32.gmra.mxu3 %vm41_vm0, %v1410_v0  ;;  %v1350_v0 = vmul.f32 %v2859_v20, %v2859_v20 }
 0x1b8   :  { %v1346_v54 = vand.u32 2147483647, %v1330_v38  ;;  %2197 = vmatmul.msk.f32.gmra.mxu1 %vm41_vm0, %v1684_v23  ;;  %v1352_v23 = vmul.f32 %v2903_v26, %v2903_v26 }
 0x1b9   :  { %v1119_v3 = vadd.f32 %v1118_v57, %v1103_v13  ;;  %v971_v17 = vpop.f32.mrf.mxu2 }
 0x1ba   :  { %v1036_v22 = vpop.f32.mrf.mxu3  ;;  %v3039_v29 = vmul.f32 %v1362_v46, %v1346_v54  ;;  %v1368_v26 = vmul.f32 %v1352_v23, %v1336_v52 }
 0x1bb   :  { %v1056_v59 = vsub.f32 %v971_v17, %v1036_v22  ;;  %v1088_v28 = vmul.f32 %v1036_v22, %v1036_v22  ;;  %v1248_v39 = vpop.f32.mrf.mxu0  ;;  %v1366_v22 = vmul.f32 %v1350_v0, %v1334_v6 }
 0x1bd   :  { %v1072_v27 = vand.u32 2147483647, %v1056_v59  ;;  %v1313_v40 = vpop.f32.mrf.mxu1 }
 0x1be   :  { %2150 = vmatmul.msk.f32.gmra.mxu2 %vm41_vm0, %v1411_v25  ;;  %v1331_v30 = vsub.f32 %v1248_v39, %v1313_v40  ;;  %v1363_v45 = vmul.f32 %v1313_v40, %v1313_v40  ;;  %2182 = vmatmul.msk.f32.gmra.mxu0 %vm41_vm0, %v1685_v63 }
 0x1bf   :  { %v1104_v5 = vmul.f32 %v1088_v28, %v1072_v27  ;;  %2166 = vmatmul.msk.f32.gmra.mxu3 %vm41_vm0, %v1411_v25  ;;  %v1322_v25 = vsub.f32 %v2931_v55, %v2933_v56  ;;  %v1337_v27 = vand.u32 2147483647, %v1321_v34 }
 0x1c0   :  { %v1347_v32 = vand.u32 2147483647, %v1331_v30  ;;  %2198 = vmatmul.msk.f32.gmra.mxu1 %vm41_vm0, %v1685_v63  ;;  %v1354_v30 = vmul.f32 %v2933_v56, %v2933_v56 }
 0x1c1   :  { %v1120_v18 = vadd.f32 %v1119_v3, %v1104_v5  ;;  %v974_v47 = vpop.f32.mrf.mxu2  ;;  %v1335_v3 = vand.u32 2147483647, %v1319_v42  ;;  %v1338_v55 = vand.u32 2147483647, %v1322_v25  ;;  %v1369_v58 = vmul.f32 %v1353_v62, %v1337_v27 }
 0x1c2   :  { %v1039_v36 = vpop.f32.mrf.mxu3  ;;  %v3056_v57 = vmul.f32 %v1363_v45, %v1347_v32  ;;  %v1339_v45 = vand.u32 2147483647, %v1323_v60 }
 0x1c3   :  { %v1057_v44 = vsub.f32 %v974_v47, %v1039_v36  ;;  %v1089_v49 = vmul.f32 %v1039_v36, %v1039_v36  ;;  %v1751_v35 = vpop.f32.mrf.mxu0  ;;  %v1367_v5 = vmul.f32 %v1351_v2, %v1335_v3 }
 0x1c5   :  { %v1073_v1 = vand.u32 2147483647, %v1057_v44  ;;  %v1816_v37 = vpop.f32.mrf.mxu1  ;;  %v1355_v44 = vmul.f32 %v2947_v21, %v2947_v21 }
 0x1c6   :  { %v1864_v13 = vsub.f32 %v1751_v35, %v1816_v37  ;;  %v1896_v59 = vmul.f32 %v1816_v37, %v1816_v37 }
 0x1c7   :  { %v1105_v31 = vmul.f32 %v1089_v49, %v1073_v1  ;;  %v1370_v1 = vmul.f32 %v1354_v30, %v1338_v55  ;;  %v1371_v56 = vmul.f32 %v1355_v44, %v1339_v45 }
 0x1c8   :  { %v1880_v38 = vand.u32 2147483647, %v1864_v13 }
 0x1c9   :  { %v1121_v10 = vadd.f32 %v1120_v18, %v1105_v31  ;;  %v1477_v11 = vpop.f32.mrf.mxu2 }
 0x1ca   :  { %v1542_v41 = vpop.f32.mrf.mxu3  ;;  %v3076_v28 = vmul.f32 %v1896_v59, %v1880_v38 }
 0x1cb   :  { %v1380_v17 = vadd.f32 %v1364_v16, %v1121_v10  ;;  %v1590_v20 = vsub.f32 %v1477_v11, %v1542_v41  ;;  %v1622_v9 = vmul.f32 %v1542_v41, %v1542_v41  ;;  %v1754_v18 = vpop.f32.mrf.mxu0 }
 0x1cd   :  { %v1381_v54 = vadd.f32 %v1380_v17, %v1365_v14  ;;  %v1606_v46 = vand.u32 2147483647, %v1590_v20  ;;  %v1819_v47 = vpop.f32.mrf.mxu1 }
 0x1ce   :  { %v1865_v63 = vsub.f32 %v1754_v18, %v1819_v47  ;;  %v1897_v51 = vmul.f32 %v1819_v47, %v1819_v47 }
 0x1cf   :  { %v1382_v39 = vadd.f32 %v1381_v54, %v1366_v22  ;;  %v3080_v40 = vmul.f32 %v1622_v9, %v1606_v46 }
 0x1d0   :  { %v1881_v15 = vand.u32 2147483647, %v1865_v63 }
 0x1d1   :  { %v1383_v43 = vadd.f32 %v1382_v39, %v1367_v5  ;;  %v1480_v36 = vpop.f32.mrf.mxu2 }
 0x1d2   :  { %v1545_v32 = vpop.f32.mrf.mxu3  ;;  %v3086_v42 = vmul.f32 %v1897_v51, %v1881_v15 }
 0x1d3   :  { %v1384_v53 = vadd.f32 %v1383_v43, %v1368_v26  ;;  %v1591_v24 = vsub.f32 %v1480_v36, %v1545_v32  ;;  %v1623_v19 = vmul.f32 %v1545_v32, %v1545_v32  ;;  %v1757_v0 = vpop.f32.mrf.mxu0 }
 0x1d5   :  { %v1385_v49 = vadd.f32 %v1384_v53, %v1369_v58  ;;  %v1607_v61 = vand.u32 2147483647, %v1591_v24  ;;  %v1822_v48 = vpop.f32.mrf.mxu1 }
 0x1d6   :  { %v1866_v21 = vsub.f32 %v1757_v0, %v1822_v48  ;;  %v1898_v16 = vmul.f32 %v1822_v48, %v1822_v48 }
 0x1d7   :  { %v1386_v31 = vadd.f32 %v1385_v49, %v1370_v1  ;;  %v1639_v6 = vmul.f32 %v1623_v19, %v1607_v61 }
 0x1d8   :  { %v1882_v14 = vand.u32 2147483647, %v1866_v21 }
 0x1d9   :  { %v1387_v35 = vadd.f32 %v1386_v31, %v1371_v56  ;;  %v1483_v37 = vpop.f32.mrf.mxu2 }
 0x1da   :  { %v1548_v10 = vpop.f32.mrf.mxu3  ;;  %v3090_v3 = vmul.f32 %v1898_v16, %v1882_v14 }
 0x1db   :  { %v1388_v11 = vadd.f32 %v1387_v35, %v2967_v33  ;;  %v1592_v13 = vsub.f32 %v1483_v37, %v1548_v10  ;;  %v1624_v41 = vmul.f32 %v1548_v10, %v1548_v10  ;;  %v1760_v38 = vpop.f32.mrf.mxu0 }
 0x1dd   :  { %v1389_v2 = vadd.f32 %v1388_v11, %v2979_v50  ;;  %v1608_v34 = vand.u32 2147483647, %v1592_v13  ;;  %v1825_v22 = vpop.f32.mrf.mxu1 }
 0x1de   :  { %v1867_v59 = vsub.f32 %v1760_v38, %v1825_v22  ;;  %v1899_v25 = vmul.f32 %v1825_v22, %v1825_v22 }
 0x1df   :  { %v1390_v17 = vadd.f32 %v1389_v2, %v2991_v12  ;;  %v1640_v20 = vmul.f32 %v1624_v41, %v1608_v34 }
 0x1e0   :  { %v1883_v9 = vand.u32 2147483647, %v1867_v59 }
 0x1e1   :  { %v1391_v52 = vadd.f32 %v1390_v17, %v3003_v7  ;;  %v1486_v23 = vpop.f32.mrf.mxu2 }
 0x1e2   :  { %v1551_v54 = vpop.f32.mrf.mxu3  ;;  %v3096_v5 = vmul.f32 %v1899_v25, %v1883_v9 }
 0x1e3   :  { %v1392_v33 = vadd.f32 %v1391_v52, %v3015_v8  ;;  %v1593_v46 = vsub.f32 %v1486_v23, %v1551_v54  ;;  %v1625_v62 = vmul.f32 %v1551_v54, %v1551_v54  ;;  %v1763_v39 = vpop.f32.mrf.mxu0 }
 0x1e5   :  { %v1393_v50 = vadd.f32 %v1392_v33, %v3027_v4  ;;  %v1609_v27 = vand.u32 2147483647, %v1593_v46  ;;  %v1828_v26 = vpop.f32.mrf.mxu1 }
 0x1e6   :  { %v1868_v47 = vsub.f32 %v1763_v39, %v1828_v26  ;;  %v1900_v55 = vmul.f32 %v1828_v26, %v1828_v26 }
 0x1e7   :  { %v1394_v12 = vadd.f32 %v1393_v50, %v3039_v29  ;;  %v1641_v60 = vmul.f32 %v1625_v62, %v1609_v27 }
 0x1e8   :  { %v1884_v36 = vand.u32 2147483647, %v1868_v47 }
 0x1e9   :  { %v1395_v7 = vadd.f32 %v1394_v12, %v3056_v57  ;;  %v1489_v18 = vpop.f32.mrf.mxu2 }
 0x1ea   :  { %v1554_v30 = vpop.f32.mrf.mxu3  ;;  %v3101_v44 = vmul.f32 %v1900_v55, %v1884_v36 }
 0x1eb   :  { %v1654_v8 = vadd.f32 %v3080_v40, %v1395_v7  ;;  %v1594_v43 = vsub.f32 %v1489_v18, %v1554_v30  ;;  %v1626_v58 = vmul.f32 %v1554_v30, %v1554_v30  ;;  %v3103_v57 = vpop.f32.mrf.mxu0 }
 0x1ed   :  { %v1655_v4 = vadd.f32 %v1654_v8, %v1639_v6  ;;  %v1610_v63 = vand.u32 2147483647, %v1594_v43  ;;  %v3105_v51 = vpop.f32.mrf.mxu1 }
 0x1ef   :  { %v1656_v32 = vadd.f32 %v1655_v4, %v1640_v20  ;;  %v1642_v29 = vmul.f32 %v1626_v58, %v1610_v63 }
 0x1f1   :  { %v1657_v45 = vadd.f32 %v1656_v32, %v1641_v60  ;;  %v1492_v53 = vpop.f32.mrf.mxu2 }
 0x1f2   :  { %v1557_v24 = vpop.f32.mrf.mxu3 }
 0x1f3   :  { %v1658_v15 = vadd.f32 %v1657_v45, %v1642_v29  ;;  %v3107_v61 = vpop.f32.mrf.mxu0  ;;  %v1595_v41 = vsub.f32 %v1492_v53, %v1557_v24  ;;  %v1627_v25 = vmul.f32 %v1557_v24, %v1557_v24 }
 0x1f5   :  { %v3109_v56 = vpop.f32.mrf.mxu1  ;;  %v1611_v23 = vand.u32 2147483647, %v1595_v41 }
 0x1f7   :  { %v1643_v46 = vmul.f32 %v1627_v25, %v1611_v23 }
 0x1f9   :  { %v1495_v1 = vpop.f32.mrf.mxu2  ;;  %v1659_v18 = vadd.f32 %v1658_v15, %v1643_v46 }
 0x1fa   :  { %v1560_v49 = vpop.f32.mrf.mxu3 }
 0x1fb   :  { %v3111_v0 = vpop.f32.mrf.mxu0  ;;  %v1596_v38 = vsub.f32 %v1495_v1, %v1560_v49  ;;  %v1628_v9 = vmul.f32 %v1560_v49, %v1560_v49 }
 0x1fd   :  { %v3113_v48 = vpop.f32.mrf.mxu1  ;;  %v1612_v54 = vand.u32 2147483647, %v1596_v38 }
 0x1ff   :  { %v1644_v12 = vmul.f32 %v1628_v9, %v1612_v54 }
 0x201   :  { %v1498_v40 = vpop.f32.mrf.mxu2  ;;  %v1660_v4 = vadd.f32 %v1659_v18, %v1644_v12 }
 0x202   :  { %v1563_v19 = vpop.f32.mrf.mxu3 }
 0x203   :  { %v3115_v21 = vpop.f32.mrf.mxu0  ;;  %v1597_v59 = vsub.f32 %v1498_v40, %v1563_v19  ;;  %v1629_v60 = vmul.f32 %v1563_v19, %v1563_v19 }
 0x205   :  { %v3117_v16 = vpop.f32.mrf.mxu1  ;;  %v1613_v50 = vand.u32 2147483647, %v1597_v59 }
 0x207   :  { %v1645_v47 = vmul.f32 %v1629_v60, %v1613_v50 }
 0x209   :  { %v1501_v31 = vpop.f32.mrf.mxu2  ;;  %v1661_v45 = vadd.f32 %v1660_v4, %v1645_v47  ;;  %v1870_v4 = vsub.f32 %v3107_v61, %v3109_v56 }
 0x20a   :  { %v1566_v6 = vpop.f32.mrf.mxu3 }
 0x20b   :  { %v3119_v13 = vpop.f32.mrf.mxu0  ;;  %v1598_v33 = vsub.f32 %v1501_v31, %v1566_v6  ;;  %v1630_v55 = vmul.f32 %v1566_v6, %v1566_v6 }
 0x20d   :  { %v3121_v14 = vpop.f32.mrf.mxu1  ;;  %v1614_v39 = vand.u32 2147483647, %v1598_v33 }
 0x20f   :  { %v1646_v63 = vmul.f32 %v1630_v55, %v1614_v39 }
 0x211   :  { %v1504_v35 = vpop.f32.mrf.mxu2  ;;  %v1662_v15 = vadd.f32 %v1661_v45, %v1646_v63 }
 0x212   :  { %v1569_v37 = vpop.f32.mrf.mxu3 }
 0x213   :  { %v3123_v20 = vpop.f32.mrf.mxu0  ;;  %v1599_v27 = vsub.f32 %v1504_v35, %v1569_v37  ;;  %v1631_v58 = vmul.f32 %v1569_v37, %v1569_v37 }
 0x215   :  { %v3125_v52 = vpop.f32.mrf.mxu1  ;;  %v1615_v43 = vand.u32 2147483647, %v1599_v27 }
 0x217   :  { %v1647_v53 = vmul.f32 %v1631_v58, %v1615_v43 }
 0x219   :  { %v1507_v10 = vpop.f32.mrf.mxu2  ;;  %v1663_v41 = vadd.f32 %v1662_v15, %v1647_v53  ;;  %v1886_v53 = vand.u32 2147483647, %v1870_v4 }
 0x21a   :  { %v1572_v11 = vpop.f32.mrf.mxu3 }
 0x21b   :  { %v1600_v7 = vsub.f32 %v1507_v10, %v1572_v11  ;;  %v3127_v30 = vpop.f32.mrf.mxu0  ;;  %v1632_v24 = vmul.f32 %v1572_v11, %v1572_v11 }
 0x21d   :  { %v3129_v8 = vpop.f32.mrf.mxu1  ;;  %v1616_v32 = vand.u32 2147483647, %v1600_v7 }
 0x21f   :  { %v1648_v31 = vmul.f32 %v1632_v24, %v1616_v32  ;;  %v1901_v32 = vmul.f32 %v3105_v51, %v3105_v51 }
 0x221   :  { %v1510_v2 = vpop.f32.mrf.mxu2 }
 0x222   :  { %v1575_v34 = vpop.f32.mrf.mxu3 }
 0x223   :  { %v1601_v36 = vsub.f32 %v1510_v2, %v1575_v34  ;;  %v1633_v6 = vmul.f32 %v1575_v34, %v1575_v34  ;;  %v3131_v59 = vpop.f32.mrf.mxu0 }
 0x225   :  { %v1617_v1 = vand.u32 2147483647, %v1601_v36  ;;  %v3133_v37 = vpop.f32.mrf.mxu1 }
 0x227   :  { %v1649_v38 = vmul.f32 %v1633_v6, %v1617_v1 }
 0x229   :  { %v1513_v17 = vpop.f32.mrf.mxu2 }
 0x22a   :  { %v1578_v22 = vpop.f32.mrf.mxu3 }
 0x22b   :  { %v1602_v29 = vsub.f32 %v1513_v17, %v1578_v22  ;;  %v1634_v2 = vmul.f32 %v1578_v22, %v1578_v22  ;;  %v1664_v17 = vadd.f32 %v1663_v41, %v1648_v31  ;;  %v1790_v47 = vpop.f32.mrf.mxu0 }
 0x22d   :  { %v1618_v35 = vand.u32 2147483647, %v1602_v29  ;;  %v1665_v33 = vadd.f32 %v1664_v17, %v1649_v38  ;;  %v1855_v55 = vpop.f32.mrf.mxu1  ;;  %v1871_v29 = vsub.f32 %v3111_v0, %v3113_v48  ;;  %v1873_v0 = vsub.f32 %v3119_v13, %v3121_v14 }
 0x22e   :  { %v1907_v38 = vmul.f32 %v3129_v8, %v3129_v8 }
 0x22f   :  { %v1650_v25 = vmul.f32 %v1634_v2, %v1618_v35  ;;  %v1889_v6 = vand.u32 2147483647, %v1873_v0 }
 0x231   :  { %v1516_v62 = vpop.f32.mrf.mxu2  ;;  %v1666_v34 = vadd.f32 %v1665_v33, %v1650_v25 }
 0x232   :  { %v1581_v26 = vpop.f32.mrf.mxu3 }
 0x233   :  { %v1603_v49 = vsub.f32 %v1516_v62, %v1581_v26  ;;  %v1635_v11 = vmul.f32 %v1581_v26, %v1581_v26  ;;  %v1869_v26 = vsub.f32 %v3103_v57, %v3105_v51  ;;  %v1902_v57 = vmul.f32 %v3109_v56, %v3109_v56 }
 0x234   :  { %v1903_v51 = vmul.f32 %v3113_v48, %v3113_v48  ;;  %v1874_v56 = vsub.f32 %v3123_v20, %v3125_v52  ;;  %v1905_v48 = vmul.f32 %v3121_v14, %v3121_v14 }
 0x235   :  { %v1619_v23 = vand.u32 2147483647, %v1603_v49  ;;  %v1885_v58 = vand.u32 2147483647, %v1869_v26  ;;  %v1858_v1 = vpop.f32.mrf.mxu1  ;;  %v1887_v49 = vand.u32 2147483647, %v1871_v29 }
 0x236   :  { %v1890_v35 = vand.u32 2147483647, %v1874_v56 }
 0x237   :  { %v1651_v46 = vmul.f32 %v1635_v11, %v1619_v23  ;;  %v1917_v24 = vmul.f32 %v1901_v32, %v1885_v58  ;;  %v1919_v31 = vmul.f32 %v1903_v51, %v1887_v49  ;;  %v1877_v23 = vsub.f32 %v1790_v47, %v1855_v55 }
 0x239   :  { %v1519_v40 = vpop.f32.mrf.mxu2  ;;  %v1667_v60 = vadd.f32 %v1666_v34, %v1651_v46 }
 0x23a   :  { %v1584_v19 = vpop.f32.mrf.mxu3 }
 0x23b   :  { %v1604_v10 = vsub.f32 %v1519_v40, %v1584_v19  ;;  %v1636_v9 = vmul.f32 %v1584_v19, %v1584_v19  ;;  %v1918_v40 = vmul.f32 %v1902_v57, %v1886_v53  ;;  %v1875_v19 = vsub.f32 %v3127_v30, %v3129_v8 }
 0x23c   :  { %v1921_v30 = vmul.f32 %v1905_v48, %v1889_v6 }
 0x23d   :  { %v1620_v54 = vand.u32 2147483647, %v1604_v10  ;;  %v1876_v10 = vsub.f32 %v3131_v59, %v3133_v37  ;;  %v1861_v14 = vpop.f32.mrf.mxu1  ;;  %v1893_v59 = vand.u32 2147483647, %v1877_v23 }
 0x23f   :  { %v1652_v62 = vmul.f32 %v1636_v9, %v1620_v54  ;;  %v1892_v11 = vand.u32 2147483647, %v1876_v10  ;;  %v1908_v54 = vmul.f32 %v3133_v37, %v3133_v37 }
 0x241   :  { %v1522_v50 = vpop.f32.mrf.mxu2  ;;  %v1668_v7 = vadd.f32 %v1667_v60, %v1652_v62  ;;  %v1924_v34 = vmul.f32 %v1908_v54, %v1892_v11 }
 0x242   :  { %v1587_v27 = vpop.f32.mrf.mxu3 }
 0x243   :  { %v1605_v12 = vsub.f32 %v1522_v50, %v1587_v27  ;;  %v1637_v22 = vmul.f32 %v1587_v27, %v1587_v27  ;;  %v1909_v50 = vmul.f32 %v1855_v55, %v1855_v55 }
 0x245   :  { %v1621_v39 = vand.u32 2147483647, %v1605_v12  ;;  %v1910_v12 = vmul.f32 %v1858_v1, %v1858_v1 }
 0x247   :  { %v1653_v18 = vmul.f32 %v1637_v22, %v1621_v39  ;;  %v1925_v39 = vmul.f32 %v1909_v50, %v1893_v59 }
 0x249   :  { %v1669_v43 = vadd.f32 %v1668_v7, %v1653_v18  ;;  %v1911_v7 = vmul.f32 %v1861_v14, %v1861_v14 }
 0x24b   :  { %v1928_v36 = vadd.f32 %v3076_v28, %v1669_v43  ;;  %v1872_v28 = vsub.f32 %v3115_v21, %v3117_v16 }
 0x24d   :  { %v1929_v63 = vadd.f32 %v1928_v36, %v3086_v42  ;;  %v1793_v42 = vpop.f32.mrf.mxu0  ;;  %v1888_v15 = vand.u32 2147483647, %v1872_v28 }
 0x24e   :  { %v1878_v33 = vsub.f32 %v1793_v42, %v1858_v1 }
 0x24f   :  { %v1930_v45 = vadd.f32 %v1929_v63, %v3090_v3 }
 0x250   :  { %v1894_v8 = vand.u32 2147483647, %v1878_v33 }
 0x251   :  { %v1931_v61 = vadd.f32 %v1930_v45, %v3096_v5  ;;  %v1904_v5 = vmul.f32 %v3117_v16, %v3117_v16  ;;  %v1891_v16 = vand.u32 2147483647, %v1875_v19 }
 0x252   :  { %v1926_v18 = vmul.f32 %v1910_v12, %v1894_v8 }
 0x253   :  { %v1932_v3 = vadd.f32 %v1931_v61, %v3101_v44  ;;  %v1906_v44 = vmul.f32 %v3125_v52, %v3125_v52  ;;  %v1920_v20 = vmul.f32 %v1904_v5, %v1888_v15  ;;  %v1923_v46 = vmul.f32 %v1907_v38, %v1891_v16 }
 0x255   :  { %v1933_v21 = vadd.f32 %v1932_v3, %v1917_v24  ;;  %v1922_v17 = vmul.f32 %v1906_v44, %v1890_v35  ;;  %v1796_v25 = vpop.f32.mrf.mxu0 }
 0x256   :  { %v1879_v27 = vsub.f32 %v1796_v25, %v1861_v14 }
 0x257   :  { %v1934_v13 = vadd.f32 %v1933_v21, %v1918_v40 }
 0x258   :  { %v1895_v22 = vand.u32 2147483647, %v1879_v27 }
 0x259   :  { %v1935_v41 = vadd.f32 %v1934_v13, %v1919_v31 }
 0x25a   :  { %v1927_v43 = vmul.f32 %v1911_v7, %v1895_v22 }
 0x25b   :  { %v1936_v2 = vadd.f32 %v1935_v41, %v1920_v20 }
 0x25d   :  { %v1937_v52 = vadd.f32 %v1936_v2, %v1921_v30 }
 0x25f   :  { %v1938_v9 = vadd.f32 %v1937_v52, %v1922_v17 }
 0x261   :  { %v1939_v62 = vadd.f32 %v1938_v9, %v1923_v46 }
 0x263   :  { %v1940_v60 = vadd.f32 %v1939_v62, %v1924_v34 }
 0x265   :  { %v1941_v47 = vadd.f32 %v1940_v60, %v1925_v39 }
 0x267   :  { %v1942_v26 = vadd.f32 %v1941_v47, %v1926_v18 }
 0x269   :  { %v1943_v37 = vadd.f32 %v1942_v26, %v1927_v43 }
 0x26b   :  { %1949 = vadd.xlane.f32.xlu0 %v1943_v37 }
 0x2de   :  { %v1950_v36 = vpop.xlane.xlu0 %1949 }
 0x2df   :  { %v1951_v4 = vrot.slane %v1950_v36, 4 }
 0x2e1   :  { %v1952_v63 = vadd.f32 %v1951_v4, %v1950_v36 }
 0x2e3   :  { %v1953_v58 = vrot.slane %v1952_v63, 2 }
 0x2e5   :  { %v1954_v55 = vadd.f32 %v1953_v58, %v1952_v63 }
 0x2e7   :  { %v1955_v32 = vrot.slane %v1954_v55, 1 }
 0x2e9   :  { %v1956_v29 = vadd.f32 %v1955_v32, %v1954_v55 }
 0x2eb   :  { %2203 = vpush %v1956_v29 }
 0x31c   :  { %s2204_s14 = spop %2203 }
 0x31d   :  { %1959 = sst [smem:[#allocation3]] %s2204_s14 }
 0x31e   :  { %1968 = dma.smem_to_hbm %s2220_s15, 16, %s1966_s13, [#allocation4]  }
 0x31f   :  { %2218 = dma.done.wait [#allocation4], 16  }
 0x320   :  { %2219 = vsyncadd [#allocation4], 4294967280 }
 0x321   :  { %1973 = sfence }
 0x322   :  { %1974 = vsyncpa [#allocation4], 1 }

</bundles_post_ra>
